<compile_context>
chip_gen: v7x
topology: tpu7x:2x2x1
jax: 0.10.0
libtpu: 0.0.40
codegen_flags: <defaults>
</compile_context>

<pallas_src>
import functools

import jax
import jax.numpy as jnp
from jax.experimental import pallas as pl
from jax.experimental.pallas import tpu as pltpu


_LANES = 128
_TK_MAX = 2048  # max fc6 K-chunk (rows of w6 / lanes of x) per grid step


def _round_up(a, b):
    return -(-a // b) * b


def _ktile(cin):
    """K-tiling of the fc6 contraction dim -> (tk, num_k_steps, padded_cin)."""
    if cin <= _TK_MAX:
        return cin, 1, cin                 # single chunk, full extent, no pad
    cin_p = _round_up(cin, _LANES)
    n128 = cin_p // _LANES
    best = 1
    for d in range(1, n128 + 1):           # largest 128-multiple divisor <= _TK_MAX
        if n128 % d == 0 and d * _LANES <= _TK_MAX:
            best = d
    tk = best * _LANES
    return tk, cin_p // tk, cin_p


@functools.lru_cache(maxsize=1)
def _vmem_limit_bytes():
    """Per-generation VMEM budget: ~3/4 of capacity, capped at 100 MiB."""
    try:
        cap = int(pltpu.get_tpu_info().vmem_capacity_bytes)
    except Exception:
        return 48 * 1024 * 1024            # conservative fallback, fits all gens
    return min((cap * 3) // 4, 100 * 1024 * 1024)


def _weight_spec(shape, index_map, single_buffer=True):
    """BlockSpec for grid-invariant blocks: single-buffer them when possible."""
    if single_buffer and hasattr(pl, "Buffered"):
        try:
            return pl.BlockSpec(shape, index_map, pipeline_mode=pl.Buffered(1))
        except TypeError:
            pass
    return pl.BlockSpec(shape, index_map)


def detect_kernel(x_ref, p_ref, w6_ref, b6_ref, w7_ref, b7_ref, wh_ref, bh_ref,
                  y_ref, h_acc):
    k = pl.program_id(1)
    nk = pl.num_programs(1)
    cdt = w6_ref.dtype                      # MXU input dtype (bf16 or f32)

    @pl.when(k == 0)
    def _():
        h_acc[...] = jnp.zeros_like(h_acc)

    # fc6 partial product for this K chunk (f32 accumulation in VMEM scratch)
    x = x_ref[...].astype(cdt)
    h_acc[...] += jnp.dot(x, w6_ref[...], preferred_element_type=jnp.float32)

    @pl.when(k == nk - 1)
    def _():
        # fc6 bias + relu
        h = jnp.maximum(h_acc[...] + b6_ref[...], 0.0).astype(cdt)
        # fc7 + relu
        h = jnp.dot(h, w7_ref[...], preferred_element_type=jnp.float32) + b7_ref[...]
        h = jnp.maximum(h, 0.0).astype(cdt)
        # fused heads: cols [0:4] = bbox_pred, [4:5+nc] = cls_score, rest zero pad
        out = jnp.dot(h, wh_ref[...], preferred_element_type=jnp.float32) + bh_ref[...]

        w_p = out.shape[1]
        col = jax.lax.broadcasted_iota(jnp.int32, (1, w_p), 1)     # (1, w_p)
        sig_mask = (col < 2) | ((col >= 4) & (col <= 12))           # hard-coded list

        # one full-slab exp; sigmoid and exp(out) derived from it
        e = jnp.exp(-out)
        sig = 1.0 / (1.0 + e)
        expz = 1.0 / e                                              # = exp(out)
        z = jnp.where(sig_mask, sig, out)

        # bbox decode merged into the lane-dense slab (single unmasked store)
        eps = jnp.float32(1e-6)
        p = p_ref[...]                                              # f32, cols 0..3 used
        p0 = p[:, 0:1]
        p1 = p[:, 1:2]
        sp2 = p[:, 2:3] + eps
        sp3 = p[:, 3:4] + eps

        base = jnp.where(col < 2, z, expz)                  # cols 0,1 post-sigmoid; 2,3 exp
        scale = jnp.where(col % 2 == 0, sp2, sp3)           # cols 0,2 -> p2+eps; 1,3 -> p3+eps
        mult = jnp.where(col == 0, 1.0, 1024.0)
        add = jnp.where(col == 0, p0 * 1024.0, jnp.where(col == 1, p1 * 1024.0, 0.0))
        decoded = base * scale * mult + add

        y_ref[...] = jnp.where(col < 4, decoded, z)


def prepare_params(params, nc, compute_dtype=jnp.bfloat16):
    """Pad / cast weights once (outside the per-call path).

    bbox_pred and cls_score are fused into one lane-padded head weight so the
    kernel does a single lane-dense matmul and one unmasked output store.
    """
    cin, rep = params["w6t"].shape
    rep_p = _round_up(rep, _LANES)
    w_p = _round_up(5 + nc, _LANES)
    _, _, cin_pk = _ktile(cin)
    cdt = compute_dtype
    f32 = jnp.float32

    w6 = jnp.zeros((cin_pk, rep_p), cdt).at[:cin, :rep].set(params["w6t"].astype(cdt))
    b6 = jnp.zeros((1, rep_p), f32).at[:, :rep].set(params["b6"].astype(f32))
    w7 = jnp.zeros((rep_p, rep_p), cdt).at[:rep, :rep].set(params["w7t"].astype(cdt))
    b7 = jnp.zeros((1, rep_p), f32).at[:, :rep].set(params["b7"].astype(f32))

    wh = jnp.zeros((rep_p, w_p), cdt)
    wh = wh.at[:rep, 0:4].set(params["wbt"].astype(cdt))
    wh = wh.at[:rep, 4:5 + nc].set(params["wct"].astype(cdt))
    bh = jnp.zeros((1, w_p), f32)
    bh = bh.at[:, 0:4].set(params["bb"].astype(f32))
    bh = bh.at[:, 4:5 + nc].set(params["bc"].astype(f32))

    return {"w6": w6, "b6": b6, "w7": w7, "b7": b7, "wh": wh, "bh": bh}


@functools.partial(jax.jit, static_argnames=("nc", "tm_max"))
def detect_forward(x, propos, prepared, *, nc, tm_max=256):
    N, cin = x.shape
    w6, b6 = prepared["w6"], prepared["b6"]
    w7, b7 = prepared["w7"], prepared["b7"]
    wh, bh = prepared["wh"], prepared["bh"]

    tk, nk, cin_pk = _ktile(cin)
    assert w6.shape[0] == cin_pk, "prepared params do not match x feature dim"
    rep_p = w6.shape[1]
    w_p = wh.shape[1]
    width = 5 + nc

    # Row tiling: aim for >=2 grid steps (keeps both v7x TensorCores busy),
    # capped at tm_max rows. TODO(synk): on v6e/v5e production shapes raise
    # tm_max (e.g. 512) once weights are single-buffered / resident.
    tm = min(tm_max, max(8, _round_up(-(-N // 2), 8)))
    n_p = _round_up(N, tm)
    m_tiles = n_p // tm

    # x is consumed directly (f32 read once, cast in-kernel); only pad when the
    # row count is not a tile multiple or the K dim needs chunk padding.
    if n_p != N or cin_pk != cin:
        x_in = jnp.zeros((n_p, cin_pk), x.dtype).at[:N, :cin].set(x)
    else:
        x_in = x

    # Proposals zero-padded to a full 128-lane block (no 4-lane strided DMA).
    pp = jnp.zeros((n_p, _LANES), jnp.float32).at[:N, :4].set(propos.astype(jnp.float32))

    in_specs = [
        pl.BlockSpec((tm, tk), lambda i, k: (i, k)),               # x (K-chunked)
        pl.BlockSpec((tm, _LANES), lambda i, k: (i, 0)),           # proposals
        _weight_spec((tk, rep_p), lambda i, k: (k, 0),
                     single_buffer=(nk == 1)),                     # fc6 weight^T (streamed)
        _weight_spec((1, rep_p), lambda i, k: (0, 0)),             # fc6 bias
        _weight_spec((rep_p, rep_p), lambda i, k: (0, 0)),         # fc7 weight^T
        _weight_spec((1, rep_p), lambda i, k: (0, 0)),             # fc7 bias
        _weight_spec((rep_p, w_p), lambda i, k: (0, 0)),           # fused head weight^T
        _weight_spec((1, w_p), lambda i, k: (0, 0)),               # fused head bias
    ]

    y_pad = pl.pallas_call(
        detect_kernel,
        out_shape=jax.ShapeDtypeStruct((n_p, w_p), jnp.float32),
        grid_spec=pltpu.PrefetchScalarGridSpec(
            num_scalar_prefetch=0,
            grid=(m_tiles, nk),                       # K-reduction axis last
            in_specs=in_specs,
            out_specs=pl.BlockSpec((tm, w_p), lambda i, k: (i, 0)),
            scratch_shapes=[pltpu.VMEM((tm, rep_p), jnp.float32)],  # fc6 accumulator
        ),
        compiler_params=pltpu.CompilerParams(
            dimension_semantics=("parallel", "arbitrary"),
            vmem_limit_bytes=_vmem_limit_bytes()),
    )(x_in, pp, w6, b6, w7, b7, wh, bh)

    y = y_pad[:N, :width]
    # PyTorch returns (y, x) where x = y.unsqueeze(0) aliases y's storage;
    # in JAX we return a fresh array with the same values.
    return y, y[None, ...]


def init_params(key, in_channels, representation_size, nc):
    ks = jax.random.split(key, 8)
    scale = 0.05
    return {
        "w6t": scale * jax.random.normal(ks[0], (in_channels, representation_size), jnp.float32),
        "b6":  scale * jax.random.normal(ks[1], (1, representation_size), jnp.float32),
        "w7t": scale * jax.random.normal(ks[2], (representation_size, representation_size), jnp.float32),
        "b7":  scale * jax.random.normal(ks[3], (1, representation_size), jnp.float32),
        "wct": scale * jax.random.normal(ks[4], (representation_size, nc + 1), jnp.float32),
        "bc":  scale * jax.random.normal(ks[5], (1, nc + 1), jnp.float32),
        "wbt": scale * jax.random.normal(ks[6], (representation_size, 4), jnp.float32),
        "bb":  scale * jax.random.normal(ks[7], (1, 4), jnp.float32),
    }


def detect_reference(x, propos, params, nc):
    """Pure-JAX f32 reference mirroring the PyTorch eval forward."""
    h = jax.nn.relu(x @ params["w6t"] + params["b6"])
    h = jax.nn.relu(h @ params["w7t"] + params["b7"])
    scores = h @ params["wct"] + params["bc"]
    bbox = h @ params["wbt"] + params["bb"]
    out = jnp.concatenate([bbox, scores], axis=1)
    cols = jnp.array([0, 1, 4, 5, 6, 7, 8, 9, 10, 11, 12])
    out = out.at[:, cols].set(jax.nn.sigmoid(out[:, cols]))
    eps = 1e-6
    p0, p1, p2, p3 = propos[:, 0], propos[:, 1], propos[:, 2], propos[:, 3]
    out = out.at[:, 0].set(out[:, 0] * (p2 + eps) + p0 * 1024.0)
    out = out.at[:, 1].set((out[:, 1] * (p3 + eps) + p1) * 1024.0)
    out = out.at[:, 2].set(jnp.exp(out[:, 2]) * (p2 + eps) * 1024.0)
    out = out.at[:, 3].set(jnp.exp(out[:, 3]) * (p3 + eps) * 1024.0)
    return out, out[None, ...]


if __name__ == "__main__":
    nc = 16                    # -> output width = 5 + nc = 21 (lane-padded to 128)
    in_channels = 192          # <= 2048 -> single K chunk, no lane padding of x
    representation_size = 96   # padded to 128 lanes in prepare_params
    n_proposals = 512          # -> tm = 256, grid = (2, 1)

    key = jax.random.PRNGKey(0)
    kx, kp, kw = jax.random.split(key, 3)

    x = jax.random.normal(kx, (n_proposals, in_channels), jnp.float32)
    propos = jax.random.uniform(kp, (n_proposals, 4), jnp.float32,
                                minval=0.05, maxval=0.9)
    params = init_params(kw, in_channels, representation_size, nc)

    y_ref, x_ref = detect_reference(x, propos, params, nc)

    # f32 compute path: tight numerical check against the reference
    prep32 = prepare_params(params, nc, compute_dtype=jnp.float32)
    y32, x32 = detect_forward(x, propos, prep32, nc=nc)
    y32 = jax.block_until_ready(y32)
    x32 = jax.block_until_ready(x32)
    assert y32.shape == (n_proposals, 5 + nc)
    assert x32.shape == (1, n_proposals, 5 + nc)
    assert jnp.allclose(y32, y_ref, rtol=1e-3, atol=1e-2), "f32 mismatch vs reference"
    assert jnp.allclose(x32, x_ref, rtol=1e-3, atol=1e-2), "f32 mismatch vs reference"

    # bf16 compute path (production default): loose check against f32 reference
    prepbf = prepare_params(params, nc, compute_dtype=jnp.bfloat16)
    yb, xb = detect_forward(x, propos, prepbf, nc=nc)
    yb = jax.block_until_ready(yb)
    xb = jax.block_until_ready(xb)
    assert yb.shape == (n_proposals, 5 + nc)
    assert bool(jnp.all(jnp.isfinite(yb)))
    assert jnp.allclose(yb, y_ref, rtol=5e-2, atol=5e-1), "bf16 mismatch vs reference"

    print("KERNEL_OK")
</pallas_src>

<mosaic_0001>
module attributes {stable_mosaic.version = 11 : i64} {
  func.func @detect_kernel(%arg0: i32, %arg1: i32, %arg2: memref<256x192xf32, #tpu.memory_space<vmem>>, %arg3: memref<256x128xf32, #tpu.memory_space<vmem>>, %arg4: memref<192x128xf32, #tpu.memory_space<vmem>>, %arg5: memref<1x128xf32, #tpu.memory_space<vmem>>, %arg6: memref<128x128xf32, #tpu.memory_space<vmem>>, %arg7: memref<1x128xf32, #tpu.memory_space<vmem>>, %arg8: memref<128x128xf32, #tpu.memory_space<vmem>>, %arg9: memref<1x128xf32, #tpu.memory_space<vmem>>, %arg10: memref<256x128xf32, #tpu.memory_space<vmem>>, %arg11: memref<256x128xf32, #tpu.memory_space<vmem>>) attributes {dimension_semantics = [#tpu.dimension_semantics<parallel>, #tpu.dimension_semantics<arbitrary>], iteration_bounds = array<i64: 2, 1>, scalar_prefetch = 0 : i64, scratch_operands = 1 : i64, tpu.core_type = #tpu.core_type<tc>, window_params = [{transform_indices = @transform_0, window_bounds = array<i64: 256, 192>}, {transform_indices = @transform_1, window_bounds = array<i64: 256, 128>}, {pipeline_mode = #tpu.pipeline_mode<synchronous>, transform_indices = @transform_2, window_bounds = array<i64: 192, 128>}, {pipeline_mode = #tpu.pipeline_mode<synchronous>, transform_indices = @transform_3, window_bounds = array<i64: 1, 128>}, {pipeline_mode = #tpu.pipeline_mode<synchronous>, transform_indices = @transform_4, window_bounds = array<i64: 128, 128>}, {pipeline_mode = #tpu.pipeline_mode<synchronous>, transform_indices = @transform_5, window_bounds = array<i64: 1, 128>}, {pipeline_mode = #tpu.pipeline_mode<synchronous>, transform_indices = @transform_6, window_bounds = array<i64: 128, 128>}, {pipeline_mode = #tpu.pipeline_mode<synchronous>, transform_indices = @transform_7, window_bounds = array<i64: 1, 128>}, {transform_indices = @transform_8, window_bounds = array<i64: 256, 128>}]} {
    %c0_i32 = arith.constant 0 : i32
    %0 = arith.cmpi eq, %arg1, %c0_i32 : i32
    %1 = arith.extui %0 : i1 to i32
    %c0_i32_0 = arith.constant 0 : i32
    %2 = arith.cmpi ne, %1, %c0_i32_0 : i32
    scf.if %2 {
      %cst_10 = arith.constant 0.000000e+00 : f32
      %12 = vector.broadcast %cst_10 : f32 to vector<256x128xf32>
      %c0_11 = arith.constant 0 : index
      %c0_12 = arith.constant 0 : index
      %13 = vector.load %arg11[%c0_11, %c0_12] : memref<256x128xf32, #tpu.memory_space<vmem>>, vector<256x128xf32>
      tpu.vector_store %arg11[%c0_11, %c0_12], %12 {strides = array<i32>} : memref<256x128xf32, #tpu.memory_space<vmem>>, vector<256x128xf32>,
    } else {
    }
    %c0 = arith.constant 0 : index
    %c0_1 = arith.constant 0 : index
    %3 = vector.load %arg2[%c0, %c0_1] : memref<256x192xf32, #tpu.memory_space<vmem>>, vector<256x192xf32>
    %c0_2 = arith.constant 0 : index
    %c0_3 = arith.constant 0 : index
    %4 = vector.load %arg11[%c0_2, %c0_3] : memref<256x128xf32, #tpu.memory_space<vmem>>, vector<256x128xf32>
    %c0_4 = arith.constant 0 : index
    %c0_5 = arith.constant 0 : index
    %5 = vector.load %arg4[%c0_4, %c0_5] : memref<192x128xf32, #tpu.memory_space<vmem>>, vector<192x128xf32>
    %cst = arith.constant dense<0.000000e+00> : vector<256x128xf32>
    %6 = tpu.matmul %3, %5, %cst {dimension_numbers = #tpu.dot_dimension_numbers<[1], [0], [0], [1], [0, 0, 1, 1], [], []>} : vector<256x192xf32>, vector<192x128xf32>, vector<256x128xf32> -> vector<256x128xf32>
    %7 = arith.addf %4, %6 : vector<256x128xf32>
    %c0_6 = arith.constant 0 : index
    %c0_7 = arith.constant 0 : index
    %8 = vector.load %arg11[%c0_6, %c0_7] : memref<256x128xf32, #tpu.memory_space<vmem>>, vector<256x128xf32>
    tpu.vector_store %arg11[%c0_6, %c0_7], %7 {strides = array<i32>} : memref<256x128xf32, #tpu.memory_space<vmem>>, vector<256x128xf32>,
    %c0_i32_8 = arith.constant 0 : i32
    %9 = arith.cmpi eq, %arg1, %c0_i32_8 : i32
    %10 = arith.extui %9 : i1 to i32
    %c0_i32_9 = arith.constant 0 : i32
    %11 = arith.cmpi ne, %10, %c0_i32_9 : i32
    scf.if %11 {
      %c0_10 = arith.constant 0 : index
      %c0_11 = arith.constant 0 : index
      %12 = vector.load %arg11[%c0_10, %c0_11] : memref<256x128xf32, #tpu.memory_space<vmem>>, vector<256x128xf32>
      %c0_12 = arith.constant 0 : index
      %c0_13 = arith.constant 0 : index
      %13 = vector.load %arg5[%c0_12, %c0_13] : memref<1x128xf32, #tpu.memory_space<vmem>>, vector<1x128xf32>
      %14 = vector.broadcast %13 : vector<1x128xf32> to vector<256x128xf32>
      %15 = arith.addf %12, %14 : vector<256x128xf32>
      %cst_14 = arith.constant 0.000000e+00 : f32
      %16 = vector.broadcast %cst_14 : f32 to vector<256x128xf32>
      %17 = arith.maximumf %15, %16 : vector<256x128xf32>
      %c0_15 = arith.constant 0 : index
      %c0_16 = arith.constant 0 : index
      %18 = vector.load %arg6[%c0_15, %c0_16] : memref<128x128xf32, #tpu.memory_space<vmem>>, vector<128x128xf32>
      %cst_17 = arith.constant dense<0.000000e+00> : vector<256x128xf32>
      %19 = tpu.matmul %17, %18, %cst_17 {dimension_numbers = #tpu.dot_dimension_numbers<[1], [0], [0], [1], [0, 0, 1, 1], [], []>} : vector<256x128xf32>, vector<128x128xf32>, vector<256x128xf32> -> vector<256x128xf32>
      %c0_18 = arith.constant 0 : index
      %c0_19 = arith.constant 0 : index
      %20 = vector.load %arg7[%c0_18, %c0_19] : memref<1x128xf32, #tpu.memory_space<vmem>>, vector<1x128xf32>
      %21 = vector.broadcast %20 : vector<1x128xf32> to vector<256x128xf32>
      %22 = arith.addf %19, %21 : vector<256x128xf32>
      %cst_20 = arith.constant 0.000000e+00 : f32
      %23 = vector.broadcast %cst_20 : f32 to vector<256x128xf32>
      %24 = arith.maximumf %22, %23 : vector<256x128xf32>
      %c0_21 = arith.constant 0 : index
      %c0_22 = arith.constant 0 : index
      %25 = vector.load %arg8[%c0_21, %c0_22] : memref<128x128xf32, #tpu.memory_space<vmem>>, vector<128x128xf32>
      %cst_23 = arith.constant dense<0.000000e+00> : vector<256x128xf32>
      %26 = tpu.matmul %24, %25, %cst_23 {dimension_numbers = #tpu.dot_dimension_numbers<[1], [0], [0], [1], [0, 0, 1, 1], [], []>} : vector<256x128xf32>, vector<128x128xf32>, vector<256x128xf32> -> vector<256x128xf32>
      %c0_24 = arith.constant 0 : index
      %c0_25 = arith.constant 0 : index
      %27 = vector.load %arg9[%c0_24, %c0_25] : memref<1x128xf32, #tpu.memory_space<vmem>>, vector<1x128xf32>
      %28 = vector.broadcast %27 : vector<1x128xf32> to vector<256x128xf32>
      %29 = arith.addf %26, %28 : vector<256x128xf32>
      %30 = tpu.iota {dimensions = array<i32: 1>} : vector<1x128xi32>
      %c2_i32 = arith.constant 2 : i32
      %31 = vector.broadcast %c2_i32 : i32 to vector<1x128xi32>
      %32 = arith.cmpi slt, %30, %31 : vector<1x128xi32>
      %c4_i32 = arith.constant 4 : i32
      %33 = vector.broadcast %c4_i32 : i32 to vector<1x128xi32>
      %34 = arith.cmpi sge, %30, %33 : vector<1x128xi32>
      %c12_i32 = arith.constant 12 : i32
      %35 = vector.broadcast %c12_i32 : i32 to vector<1x128xi32>
      %36 = arith.cmpi sle, %30, %35 : vector<1x128xi32>
      %37 = arith.andi %34, %36 : vector<1x128xi1>
      %38 = arith.ori %32, %37 : vector<1x128xi1>
      %cst_26 = arith.constant 0.000000e+00 : f32
      %39 = vector.broadcast %cst_26 : f32 to vector<256x128xf32>
      %40 = arith.subf %39, %29 : vector<256x128xf32>
      %41 = math.exp %40 : vector<256x128xf32>
      %cst_27 = arith.constant 1.000000e+00 : f32
      %42 = vector.broadcast %cst_27 : f32 to vector<256x128xf32>
      %43 = arith.addf %42, %41 : vector<256x128xf32>
      %cst_28 = arith.constant 1.000000e+00 : f32
      %44 = vector.broadcast %cst_28 : f32 to vector<256x128xf32>
      %45 = arith.divf %44, %43 : vector<256x128xf32>
      %cst_29 = arith.constant 1.000000e+00 : f32
      %46 = vector.broadcast %cst_29 : f32 to vector<256x128xf32>
      %47 = arith.divf %46, %41 : vector<256x128xf32>
      %48 = vector.shape_cast %38 : vector<1x128xi1> to vector<1x128xi1>
      %49 = vector.broadcast %48 : vector<1x128xi1> to vector<256x128xi1>
      %50 = arith.select %49, %45, %29 : vector<256x128xi1>, vector<256x128xf32>
      %c0_30 = arith.constant 0 : index
      %c0_31 = arith.constant 0 : index
      %51 = vector.load %arg3[%c0_30, %c0_31] : memref<256x128xf32, #tpu.memory_space<vmem>>, vector<256x128xf32>
      %52 = vector.extract_strided_slice %51 {offsets = [0, 0], sizes = [256, 1], strides = [1, 1]} : vector<256x128xf32> to vector<256x1xf32>
      %53 = vector.extract_strided_slice %51 {offsets = [0, 1], sizes = [256, 1], strides = [1, 1]} : vector<256x128xf32> to vector<256x1xf32>
      %54 = vector.extract_strided_slice %51 {offsets = [0, 2], sizes = [256, 1], strides = [1, 1]} : vector<256x128xf32> to vector<256x1xf32>
      %cst_32 = arith.constant 9.99999997E-7 : f32
      %55 = vector.broadcast %cst_32 : f32 to vector<256x1xf32>
      %56 = arith.addf %54, %55 : vector<256x1xf32>
      %57 = vector.extract_strided_slice %51 {offsets = [0, 3], sizes = [256, 1], strides = [1, 1]} : vector<256x128xf32> to vector<256x1xf32>
      %cst_33 = arith.constant 9.99999997E-7 : f32
      %58 = vector.broadcast %cst_33 : f32 to vector<256x1xf32>
      %59 = arith.addf %57, %58 : vector<256x1xf32>
      %c2_i32_34 = arith.constant 2 : i32
      %60 = vector.broadcast %c2_i32_34 : i32 to vector<1x128xi32>
      %61 = arith.cmpi slt, %30, %60 : vector<1x128xi32>
      %62 = vector.shape_cast %61 : vector<1x128xi1> to vector<1x128xi1>
      %63 = vector.broadcast %62 : vector<1x128xi1> to vector<256x128xi1>
      %64 = arith.select %63, %50, %47 : vector<256x128xi1>, vector<256x128xf32>
      %c2_i32_35 = arith.constant 2 : i32
      %c0_i32_36 = arith.constant 0 : i32
      %65 = arith.cmpi eq, %c2_i32_35, %c0_i32_36 : i32
      %c1_i32 = arith.constant 1 : i32
      %66 = arith.select %65, %c1_i32, %c2_i32_35 : i32
      %67 = vector.broadcast %66 : i32 to vector<1x128xi32>
      %68 = arith.remsi %30, %67 : vector<1x128xi32>
      %c0_i32_37 = arith.constant 0 : i32
      %69 = vector.broadcast %c0_i32_37 : i32 to vector<1x128xi32>
      %70 = arith.cmpi ne, %68, %69 : vector<1x128xi32>
      %c0_i32_38 = arith.constant 0 : i32
      %71 = vector.broadcast %c0_i32_38 : i32 to vector<1x128xi32>
      %72 = arith.cmpi slt, %68, %71 : vector<1x128xi32>
      %c0_i32_39 = arith.constant 0 : i32
      %73 = arith.cmpi slt, %66, %c0_i32_39 : i32
      %74 = vector.broadcast %73 : i1 to vector<1x128xi1>
      %75 = vector.broadcast %74 : vector<1x128xi1> to vector<1x128xi1>
      %76 = arith.xori %72, %75 : vector<1x128xi1>
      %77 = arith.andi %76, %70 : vector<1x128xi1>
      %78 = vector.broadcast %66 : i32 to vector<1x128xi32>
      %79 = arith.addi %68, %78 : vector<1x128xi32>
      %80 = arith.select %77, %79, %68 : vector<1x128xi1>, vector<1x128xi32>
      %c0_i32_40 = arith.constant 0 : i32
      %81 = vector.broadcast %c0_i32_40 : i32 to vector<1x128xi32>
      %82 = arith.cmpi eq, %80, %81 : vector<1x128xi32>
      %83 = vector.shape_cast %82 : vector<1x128xi1> to vector<1x128xi1>
      %84 = vector.broadcast %83 : vector<1x128xi1> to vector<256x128xi1>
      %85 = vector.shape_cast %56 : vector<256x1xf32> to vector<256x1xf32>
      %86 = vector.broadcast %85 : vector<256x1xf32> to vector<256x128xf32>
      %87 = vector.shape_cast %59 : vector<256x1xf32> to vector<256x1xf32>
      %88 = vector.broadcast %87 : vector<256x1xf32> to vector<256x128xf32>
      %89 = arith.select %84, %86, %88 : vector<256x128xi1>, vector<256x128xf32>
      %c0_i32_41 = arith.constant 0 : i32
      %90 = vector.broadcast %c0_i32_41 : i32 to vector<1x128xi32>
      %91 = arith.cmpi eq, %30, %90 : vector<1x128xi32>
      %cst_42 = arith.constant 1.000000e+00 : f32
      %cst_43 = arith.constant 1.024000e+03 : f32
      %92 = vector.broadcast %cst_42 : f32 to vector<1x128xf32>
      %93 = vector.broadcast %cst_43 : f32 to vector<1x128xf32>
      %94 = arith.select %91, %92, %93 : vector<1x128xi1>, vector<1x128xf32>
      %c0_i32_44 = arith.constant 0 : i32
      %95 = vector.broadcast %c0_i32_44 : i32 to vector<1x128xi32>
      %96 = arith.cmpi eq, %30, %95 : vector<1x128xi32>
      %cst_45 = arith.constant 1.024000e+03 : f32
      %97 = vector.broadcast %cst_45 : f32 to vector<256x1xf32>
      %98 = arith.mulf %52, %97 : vector<256x1xf32>
      %c1_i32_46 = arith.constant 1 : i32
      %99 = vector.broadcast %c1_i32_46 : i32 to vector<1x128xi32>
      %100 = arith.cmpi eq, %30, %99 : vector<1x128xi32>
      %cst_47 = arith.constant 1.024000e+03 : f32
      %101 = vector.broadcast %cst_47 : f32 to vector<256x1xf32>
      %102 = arith.mulf %53, %101 : vector<256x1xf32>
      %cst_48 = arith.constant 0.000000e+00 : f32
      %103 = vector.shape_cast %100 : vector<1x128xi1> to vector<1x128xi1>
      %104 = vector.broadcast %103 : vector<1x128xi1> to vector<256x128xi1>
      %105 = vector.shape_cast %102 : vector<256x1xf32> to vector<256x1xf32>
      %106 = vector.broadcast %105 : vector<256x1xf32> to vector<256x128xf32>
      %107 = vector.broadcast %cst_48 : f32 to vector<256x128xf32>
      %108 = arith.select %104, %106, %107 : vector<256x128xi1>, vector<256x128xf32>
      %109 = vector.shape_cast %96 : vector<1x128xi1> to vector<1x128xi1>
      %110 = vector.broadcast %109 : vector<1x128xi1> to vector<256x128xi1>
      %111 = vector.shape_cast %98 : vector<256x1xf32> to vector<256x1xf32>
      %112 = vector.broadcast %111 : vector<256x1xf32> to vector<256x128xf32>
      %113 = arith.select %110, %112, %108 : vector<256x128xi1>, vector<256x128xf32>
      %114 = arith.mulf %64, %89 : vector<256x128xf32>
      %115 = vector.broadcast %94 : vector<1x128xf32> to vector<256x128xf32>
      %116 = arith.mulf %114, %115 : vector<256x128xf32>
      %117 = arith.addf %116, %113 : vector<256x128xf32>
      %c4_i32_49 = arith.constant 4 : i32
      %118 = vector.broadcast %c4_i32_49 : i32 to vector<1x128xi32>
      %119 = arith.cmpi slt, %30, %118 : vector<1x128xi32>
      %120 = vector.shape_cast %119 : vector<1x128xi1> to vector<1x128xi1>
      %121 = vector.broadcast %120 : vector<1x128xi1> to vector<256x128xi1>
      %122 = arith.select %121, %117, %50 : vector<256x128xi1>, vector<256x128xf32>
      %c0_50 = arith.constant 0 : index
      %c0_51 = arith.constant 0 : index
      %123 = vector.load %arg10[%c0_50, %c0_51] : memref<256x128xf32, #tpu.memory_space<vmem>>, vector<256x128xf32>
      tpu.vector_store %arg10[%c0_50, %c0_51], %122 {strides = array<i32>} : memref<256x128xf32, #tpu.memory_space<vmem>>, vector<256x128xf32>,
    } else {
    }
    return
  }
  func.func @transform_0(%arg0: i32, %arg1: i32) -> (i32, i32) {
    %c0_i32 = arith.constant 0 : i32
    return %arg0, %arg1 : i32, i32
  }
  func.func @transform_1(%arg0: i32, %arg1: i32) -> (i32, i32) {
    %c0_i32 = arith.constant 0 : i32
    %c0_i32_0 = arith.constant 0 : i32
    return %arg0, %c0_i32 : i32, i32
  }
  func.func @transform_2(%arg0: i32, %arg1: i32) -> (i32, i32) {
    %c0_i32 = arith.constant 0 : i32
    %c0_i32_0 = arith.constant 0 : i32
    return %arg1, %c0_i32 : i32, i32
  }
  func.func @transform_3(%arg0: i32, %arg1: i32) -> (i32, i32) {
    %c0_i32 = arith.constant 0 : i32
    %c0_i32_0 = arith.constant 0 : i32
    %c0_i32_1 = arith.constant 0 : i32
    return %c0_i32, %c0_i32_0 : i32, i32
  }
  func.func @transform_4(%arg0: i32, %arg1: i32) -> (i32, i32) {
    %c0_i32 = arith.constant 0 : i32
    %c0_i32_0 = arith.constant 0 : i32
    %c0_i32_1 = arith.constant 0 : i32
    return %c0_i32, %c0_i32_0 : i32, i32
  }
  func.func @transform_5(%arg0: i32, %arg1: i32) -> (i32, i32) {
    %c0_i32 = arith.constant 0 : i32
    %c0_i32_0 = arith.constant 0 : i32
    %c0_i32_1 = arith.constant 0 : i32
    return %c0_i32, %c0_i32_0 : i32, i32
  }
  func.func @transform_6(%arg0: i32, %arg1: i32) -> (i32, i32) {
    %c0_i32 = arith.constant 0 : i32
    %c0_i32_0 = arith.constant 0 : i32
    %c0_i32_1 = arith.constant 0 : i32
    return %c0_i32, %c0_i32_0 : i32, i32
  }
  func.func @transform_7(%arg0: i32, %arg1: i32) -> (i32, i32) {
    %c0_i32 = arith.constant 0 : i32
    %c0_i32_0 = arith.constant 0 : i32
    %c0_i32_1 = arith.constant 0 : i32
    return %c0_i32, %c0_i32_0 : i32, i32
  }
  func.func @transform_8(%arg0: i32, %arg1: i32) -> (i32, i32) {
    %c0_i32 = arith.constant 0 : i32
    %c0_i32_0 = arith.constant 0 : i32
    return %arg0, %c0_i32 : i32, i32
  }
}

</mosaic_0001>

<bundles_post_ra>
// kernel: detect_forward.1
= control target key start
LH: loop header
LB: loop body
LE: loop exit
PB: predicated region body
PF: predicated region fallthrough
CT: control target
= control target key end

     0   :  { %s3655_s27 = smov 0   ;;  %s3657_s28 = smov 0   ;;  %s5474_s0 = inlined_call_operand.vmem [shape: f32[512,192], index: 0, kind: input, shape index: {}]   ;;  %s5475_s1 = inlined_call_operand.vmem [shape: f32[512,128], index: 1, kind: input, shape index: {}]   ;;  %s5476_s2 = inlined_call_operand.vmem [shape: f32[192,128], index: 2, kind: input, shape index: {}]   ;;  %s5477_s3 = inlined_call_operand.vmem [shape: f32[1,128], index: 3, kind: input, shape index: {}]   ;;  %s5478_s4 = inlined_call_operand.vmem [shape: f32[128,128], index: 4, kind: input, shape index: {}]   ;;  %s5479_s5 = inlined_call_operand.vmem [shape: f32[1,128], index: 5, kind: input, shape index: {}]   ;;  %s5480_s6 = inlined_call_operand.vmem [shape: f32[128,128], index: 6, kind: input, shape index: {}]   ;;  %s5481_s7 = inlined_call_operand.vmem [shape: f32[1,128], index: 7, kind: input, shape index: {}]   ;;  %s5482_s8 = inlined_call_operand.vmem [shape: f32[512,128], index: 8, kind: output, shape index: {}]  }
   0x1   :  { %s3659_s29 = smov 0  }
   0x2 LB: > { %s30_s30 = sadd.s32 1, %s3598_s28  ;;  %p2947_p0 = scmp.ge.s32.totalorder %s3602_s29, 1  ;;  %s3602_s29 = sphi %s3659_s29, %s18_s29   ;;  %s3598_s28 = sphi %s3657_s28, %s5698_s28   ;;  %s3594_s27 = sphi %s3655_s27, %s5697_s27  }
   0x3   : > { %p32_p1 = scmp.ge.s32.totalorder %s30_s30, 2  ;;  %p305_p2 = scmp.lt.s32.totalorder %s3602_s29, 3 }
   0x5   : > { %s5700_s30 = smov (%p32_p1, %s30_s30), 0  ;;  %p306_p3 = pnand %p2947_p0, %p305_p2 }
   0x7   : > { %309 = sbr.rel (%p306_p3) target bundleno = 875 (0x36b), region = 52 }
   0xe   : > { %v516_v0 = vld [vmem:[%s5476_s2] sm:$0xff]  ;;  %v517_v1 = vld [vmem:[%s5476_s2 + $0x8] sm:$0xff]  ;;  %v518_v2 = vld [vmem:[%s5476_s2 + $0x10] sm:$0xff]  ;;  %s2948_s15 = sshll.u32 %s3594_s27, 5  ;;  %v3604_v3 = vmov 0.0|0.0   ;;  %vm540_vm0 = vcmask 523264  }
   0xf   : > { %3249 = vmatprep.subr.bf16.mxu0 %v3604_v3  ;;  %v3250_v4 = vpack.c.bf16 %v517_v1, %v516_v0  ;;  %v519_v5 = vld [vmem:[%s5476_s2 + $0x18] sm:$0xff]  ;;  %p356_p4 = scmp.lt.s32.totalorder %s2948_s15, 63  ;;  %v520_v7 = vld [vmem:[%s5476_s2 + $0x20] sm:$0xff]  ;;  %v521_v8 = vld [vmem:[%s5476_s2 + $0x28] sm:$0xff] }
  0x10   : > { %v3253_v6 = vpack.c.bf16 %v519_v5, %v518_v2  ;;  %v3256_v9 = vpack.c.bf16 %v521_v8, %v520_v7  ;;  %v522_v10 = vld [vmem:[%s5476_s2 + $0x30] sm:$0xff]  ;;  %v523_v11 = vld [vmem:[%s5476_s2 + $0x38] sm:$0xff]  ;;  %v524_v14 = vld [vmem:[%s5476_s2 + $0x40] sm:$0xff] }
  0x11   : > { %3251 = vmatpush1.bf16.msra.mxu0 %v3250_v4  ;;  %s5702_s15 = smov (!%p356_p4, %s2948_s15), 63  ;;  %v3259_v13 = vpack.c.bf16 %v523_v11, %v522_v10  ;;  %v525_v15 = vld [vmem:[%s5476_s2 + $0x48] sm:$0xff]  ;;  %v526_v17 = vld [vmem:[%s5476_s2 + $0x50] sm:$0xff]  ;;  %v527_v18 = vld [vmem:[%s5476_s2 + $0x58] sm:$0xff] }
  0x12   : > { %3252 = vmatprep.subr.bf16.mxu0 %v3604_v3  ;;  %s2992_s22 = sshll.u32 %s5702_s15, 4  ;;  %v3262_v16 = vpack.c.bf16 %v525_v15, %v524_v14  ;;  %v3265_v19 = vpack.c.bf16 %v527_v18, %v526_v17  ;;  %v528_v20 = vld [vmem:[%s5476_s2 + $0x60] sm:$0xff]  ;;  %v529_v21 = vld [vmem:[%s5476_s2 + $0x68] sm:$0xff]  ;;  %v530_v23 = vld [vmem:[%s5476_s2 + $0x70] sm:$0xff]  ;;  %s2952_s26 = sshll.u32 %s5702_s15, 3 }
  0x13   : > { %s3699_s25 = scalar_lea.vmem %s5474_s0, %s2992_s22  ;;  %v3268_v22 = vpack.c.bf16 %v529_v21, %v528_v20  ;;  %v531_v24 = vld [vmem:[%s5476_s2 + $0x78] sm:$0xff]  ;;  %v532_v26 = vld [vmem:[%s5476_s2 + $0x80] sm:$0xff]  ;;  %v533_v27 = vld [vmem:[%s5476_s2 + $0x88] sm:$0xff]  ;;  %s3915_s10 = scalar_lea.vmem %s5475_s1, %s2952_s26 }
  0x14   : > { %v421_v12 = vld [vmem:[%s3699_s25 + $0x8] sm:$0xff]  ;;  %v3271_v25 = vpack.c.bf16 %v531_v24, %v530_v23  ;;  %v3274_v28 = vpack.c.bf16 %v533_v27, %v532_v26  ;;  %v534_v29 = vld [vmem:[%s5476_s2 + $0x90] sm:$0xff]  ;;  %v535_v30 = vld [vmem:[%s5476_s2 + $0x98] sm:$0xff]  ;;  %s4812_s17 = scalar_lea.vmem %s5482_s8, %s2952_s26 }
  0x15   : > { %3254 = vmatpush1.bf16.msra.mxu0 %v3253_v6  ;;  %2955 = vmatprep.mubr.msk.f32.mxu0 %vm540_vm0, %v421_v12  ;;  %v3277_v31 = vpack.c.bf16 %v535_v30, %v534_v29  ;;  %v536_v32 = vld [vmem:[%s5476_s2 + $0xa0] sm:$0xff]  ;;  %v537_v33 = vld [vmem:[%s5476_s2 + $0xa8] sm:$0xff]  ;;  %v538_v35 = vld [vmem:[%s5476_s2 + $0xb0] sm:$0xff] }
  0x16   : > { %3255 = vmatprep.subr.bf16.mxu0 %v3604_v3  ;;  %v3280_v34 = vpack.c.bf16 %v537_v33, %v536_v32  ;;  %v539_v36 = vld [vmem:[%s5476_s2 + $0xb8] sm:$0xff]  ;;  %v1032_v38 = vld [vmem:[%s5478_s4] sm:$0xff]  ;;  %v1033_v39 = vld [vmem:[%s5478_s4 + $0x8] sm:$0xff] }
  0x17   : > { %v3283_v37 = vpack.c.bf16 %v539_v36, %v538_v35  ;;  %v1034_v40 = vld [vmem:[%s5478_s4 + $0x10] sm:$0xff]  ;;  %v420_v41 = vld [vmem:[%s3699_s25] sm:$0xff]  ;;  %v3285_v42 = vpack.c.bf16 %v1033_v39, %v1032_v38  ;;  %v1035_v43 = vld [vmem:[%s5478_s4 + $0x18] sm:$0xff] }
  0x18   : > { %v423_v44 = vld [vmem:[%s3699_s25 + $0x18] sm:$0xff]  ;;  %v3289_v45 = vpack.c.bf16 %v1035_v43, %v1034_v40  ;;  %v1036_v46 = vld [vmem:[%s5478_s4 + $0x20] sm:$0xff]  ;;  %v1037_v47 = vld [vmem:[%s5478_s4 + $0x28] sm:$0xff] }
  0x19   : > { %3257 = vmatpush1.bf16.msra.mxu0 %v3256_v9  ;;  %3286 = vmatprep.subr.bf16.mxu1 %v3285_v42  ;;  %v422_v48 = vld [vmem:[%s3699_s25 + $0x10] sm:$0xff]  ;;  %v3293_v49 = vpack.c.bf16 %v1037_v47, %v1036_v46  ;;  %v425_v50 = vld [vmem:[%s3699_s25 + $0x28] sm:$0xff]  ;;  %v1039_v52 = vld [vmem:[%s5478_s4 + $0x38] sm:$0xff] }
  0x1a   : > { %3258 = vmatprep.subr.bf16.mxu0 %v3604_v3  ;;  %3288 = vmatpush3.bf16.msra.mxu1 %v3285_v42  ;;  %v1038_v51 = vld [vmem:[%s5478_s4 + $0x30] sm:$0xff]  ;;  %v424_v53 = vld [vmem:[%s3699_s25 + $0x20] sm:$0xff]  ;;  %v427_v55 = vld [vmem:[%s3699_s25 + $0x38] sm:$0xff] }
  0x1b   : > { %3290 = vmatprep.subr.bf16.mxu1 %v3289_v45  ;;  %v3297_v54 = vpack.c.bf16 %v1039_v52, %v1038_v51  ;;  %v1040_v56 = vld [vmem:[%s5478_s4 + $0x40] sm:$0xff]  ;;  %v1041_v57 = vld [vmem:[%s5478_s4 + $0x48] sm:$0xff]  ;;  %v426_v58 = vld [vmem:[%s3699_s25 + $0x30] sm:$0xff] }
  0x1c   : > { %v3301_v59 = vpack.c.bf16 %v1041_v57, %v1040_v56  ;;  %v429_v60 = vld [vmem:[%s3699_s25 + $0x48] sm:$0xff]  ;;  %v1042_v61 = vld [vmem:[%s5478_s4 + $0x50] sm:$0xff]  ;;  %v1043_v62 = vld [vmem:[%s5478_s4 + $0x58] sm:$0xff] }
  0x1d   : > { %3260 = vmatpush1.bf16.msra.mxu0 %v3259_v13  ;;  %v428_v63 = vld [vmem:[%s3699_s25 + $0x40] sm:$0xff]  ;;  %v3305_v0 = vpack.c.bf16 %v1043_v62, %v1042_v61  ;;  %v431_v1 = vld [vmem:[%s3699_s25 + $0x58] sm:$0xff]  ;;  %v430_v2 = vld [vmem:[%s3699_s25 + $0x50] sm:$0xff] }
  0x1e   : > { %3261 = vmatprep.subr.bf16.mxu0 %v3604_v3  ;;  %3292 = vmatpush3.bf16.msra.mxu1 %v3289_v45  ;;  %v432_v4 = vld [vmem:[%s3699_s25 + $0x60] sm:$0xff]  ;;  %v435_v5 = vld [vmem:[%s3699_s25 + $0x78] sm:$0xff]  ;;  %v434_v6 = vld [vmem:[%s3699_s25 + $0x70] sm:$0xff] }
  0x1f   : > { %3294 = vmatprep.subr.bf16.mxu1 %v3293_v49  ;;  %v437_v7 = vld [vmem:[%s3699_s25 + $0x88] sm:$0xff]  ;;  %v436_v8 = vld [vmem:[%s3699_s25 + $0x80] sm:$0xff]  ;;  %v439_v9 = vld [vmem:[%s3699_s25 + $0x98] sm:$0xff] }
  0x20   : > { %v438_v10 = vld [vmem:[%s3699_s25 + $0x90] sm:$0xff]  ;;  %v441_v11 = vld [vmem:[%s3699_s25 + $0xa8] sm:$0xff]  ;;  %v440_v12 = vld [vmem:[%s3699_s25 + $0xa0] sm:$0xff] }
  0x21   : > { %3263 = vmatpush1.bf16.msra.mxu0 %v3262_v16  ;;  %v443_v13 = vld [vmem:[%s3699_s25 + $0xb8] sm:$0xff]  ;;  %v442_v14 = vld [vmem:[%s3699_s25 + $0xb0] sm:$0xff]  ;;  %v445_v15 = vld [vmem:[%s3699_s25 + $0xc8] sm:$0xff] }
  0x22   : > { %3264 = vmatprep.subr.bf16.mxu0 %v3604_v3  ;;  %3296 = vmatpush3.bf16.msra.mxu1 %v3293_v49  ;;  %v444_v16 = vld [vmem:[%s3699_s25 + $0xc0] sm:$0xff]  ;;  %v447_v17 = vld [vmem:[%s3699_s25 + $0xd8] sm:$0xff]  ;;  %v446_v18 = vld [vmem:[%s3699_s25 + $0xd0] sm:$0xff] }
  0x23   : > { %3298 = vmatprep.subr.bf16.mxu1 %v3297_v54  ;;  %v448_v20 = vld [vmem:[%s3699_s25 + $0xe0] sm:$0xff]  ;;  %v451_v21 = vld [vmem:[%s3699_s25 + $0xf8] sm:$0xff]  ;;  %v453_v23 = vld [vmem:[%s3699_s25 + $0x108] sm:$0xff] }
  0x24   : > { %v452_v24 = vld [vmem:[%s3699_s25 + $0x100] sm:$0xff]  ;;  %v454_v26 = vld [vmem:[%s3699_s25 + $0x110] sm:$0xff]  ;;  %v457_v27 = vld [vmem:[%s3699_s25 + $0x128] sm:$0xff] }
  0x25   : > { %3266 = vmatpush1.bf16.msra.mxu0 %v3265_v19  ;;  %v449_v19 = vld [vmem:[%s3699_s25 + $0xe8] sm:$0xff]  ;;  %v459_v29 = vld [vmem:[%s3699_s25 + $0x138] sm:$0xff]  ;;  %v458_v30 = vld [vmem:[%s3699_s25 + $0x130] sm:$0xff] }
  0x26   : > { %3267 = vmatprep.subr.bf16.mxu0 %v3604_v3  ;;  %3300 = vmatpush3.bf16.msra.mxu1 %v3297_v54  ;;  %v460_v32 = vld [vmem:[%s3699_s25 + $0x140] sm:$0xff]  ;;  %v463_v33 = vld [vmem:[%s3699_s25 + $0x158] sm:$0xff]  ;;  %v1045_v36 = vld [vmem:[%s5478_s4 + $0x68] sm:$0xff] }
  0x27   : > { %3302 = vmatprep.subr.bf16.mxu1 %v3301_v59  ;;  %v1044_v35 = vld [vmem:[%s5478_s4 + $0x60] sm:$0xff]  ;;  %v1046_v40 = vld [vmem:[%s5478_s4 + $0x70] sm:$0xff]  ;;  %v467_v42 = vld [vmem:[%s3699_s25 + $0x178] sm:$0xff] }
  0x28   : > { %v3309_v38 = vpack.c.bf16 %v1045_v36, %v1044_v35  ;;  %v464_v39 = vld [vmem:[%s3699_s25 + $0x160] sm:$0xff]  ;;  %v469_v45 = vld [vmem:[%s3699_s25 + $0x188] sm:$0xff]  ;;  %v471_v47 = vld [vmem:[%s3699_s25 + $0x198] sm:$0xff] }
  0x29   : > { %3269 = vmatpush1.bf16.msra.mxu0 %v3268_v22  ;;  %v450_v22 = vld [vmem:[%s3699_s25 + $0xf0] sm:$0xff]  ;;  %v468_v46 = vld [vmem:[%s3699_s25 + $0x180] sm:$0xff]  ;;  %v473_v49 = vld [vmem:[%s3699_s25 + $0x1a8] sm:$0xff] }
  0x2a   : > { %3270 = vmatprep.subr.bf16.mxu0 %v3604_v3  ;;  %3304 = vmatpush3.bf16.msra.mxu1 %v3301_v59  ;;  %v475_v51 = vld [vmem:[%s3699_s25 + $0x1b8] sm:$0xff]  ;;  %v474_v52 = vld [vmem:[%s3699_s25 + $0x1b0] sm:$0xff]  ;;  %v476_v54 = vld [vmem:[%s3699_s25 + $0x1c0] sm:$0xff] }
  0x2b   : > { %3306 = vmatprep.subr.bf16.mxu1 %v3305_v0  ;;  %v478_v56 = vld [vmem:[%s3699_s25 + $0x1d0] sm:$0xff]  ;;  %v481_v57 = vld [vmem:[%s3699_s25 + $0x1e8] sm:$0xff]  ;;  %v483_v59 = vld [vmem:[%s3699_s25 + $0x1f8] sm:$0xff] }
  0x2c   : > { %v3918_v61 = vld [vmem:[%s3915_s10] sm:$0xff] }
  0x2d   : > { %3272 = vmatpush1.bf16.msra.mxu0 %v3271_v25  ;;  %v455_v25 = vld [vmem:[%s3699_s25 + $0x118] sm:$0xff]  ;;  %v3921_v62 = vadd.f32 1e-06, %v3918_v61  ;;  %v4051_v36 = vld [vmem:[%s3915_s10 + $0xa0] sm:$0xff] }
  0x2e   : > { %3273 = vmatprep.subr.bf16.mxu0 %v3604_v3  ;;  %3308 = vmatpush3.bf16.msra.mxu1 %v3305_v0  ;;  %v3925_v0 = vld [vmem:[%s3915_s10 + $0x8] sm:$0xff]  ;;  %5530 = vst [vmem:[#allocation4_spill] sm:$0xff] %v4051_v36 }
  0x2f   : > { %3310 = vmatprep.subr.bf16.mxu1 %v3309_v38 }
  0x31   : > { %3275 = vmatpush1.bf16.msra.mxu0 %v3274_v28  ;;  %v456_v28 = vld [vmem:[%s3699_s25 + $0x120] sm:$0xff] }
  0x32   : > { %3276 = vmatprep.subr.bf16.mxu0 %v3604_v3  ;;  %3312 = vmatpush3.bf16.msra.mxu1 %v3309_v38  ;;  %v4057_v38 = vld [vmem:[%s3915_s10 + $0x98] sm:$0xff] }
  0x33   : > { %5531 = vst [vmem:[#allocation5_spill] sm:$0xff] %v4057_v38 }
  0x35   : > { %3278 = vmatpush1.bf16.msra.mxu0 %v3277_v31  ;;  %v461_v31 = vld [vmem:[%s3699_s25 + $0x148] sm:$0xff] }
  0x36   : > { %3279 = vmatprep.subr.bf16.mxu0 %v3604_v3 }
  0x39   : > { %3281 = vmatpush1.bf16.msra.mxu0 %v3280_v34  ;;  %v462_v34 = vld [vmem:[%s3699_s25 + $0x150] sm:$0xff] }
  0x3a   : > { %3282 = vmatprep.subr.bf16.mxu0 %v3604_v3  ;;  %v433_v3 = vld [vmem:[%s3699_s25 + $0x68] sm:$0xff] }
  0x3d   : > { %3284 = vmatpush1.bf16.msra.mxu0 %v3283_v37  ;;  %v465_v37 = vld [vmem:[%s3699_s25 + $0x168] sm:$0xff] }
  0x40   : > { %702 = vmatmul.mubr.f32.vlgmr.msra.gmra.mrb[0].mxu0 %v420_v41  ;;  %v1047_v41 = vld [vmem:[%s5478_s4 + $0x78] sm:$0xff] }
  0x41   : > { %2956 = vmatprep.mubr.msk.f32.mxu0 %vm540_vm0, %v423_v44  ;;  %v3313_v43 = vpack.c.bf16 %v1047_v41, %v1046_v40  ;;  %v466_v44 = vld [vmem:[%s3699_s25 + $0x170] sm:$0xff] }
  0x42   : > { %v4065_v40 = vld [vmem:[%s3915_s10 + $0xb0] sm:$0xff] }
  0x43   : > { %3314 = vmatprep.subr.bf16.mxu1 %v3313_v43  ;;  %5532 = vst [vmem:[#allocation6_spill] sm:$0xff] %v4065_v40  ;;  %v4068_v41 = vadd.f32 1e-06, %v4065_v40  ;;  %v4148_v40 = vld [vmem:[%s3915_s10 + $0xe8] sm:$0xff] }
  0x44   : > { %707 = vmatmul.mubr.f32.gmra.mrb[2].mxu0 %v422_v48  ;;  %3316 = vmatpush3.bf16.msra.mxu1 %v3313_v43  ;;  %v470_v48 = vld [vmem:[%s3699_s25 + $0x190] sm:$0xff]  ;;  %v4076_v43 = vld [vmem:[%s5477_s3] ss:$0 sm:$0xff]  ;;  %5541 = vst [vmem:[#allocation15_spill] sm:$0xff] %v4148_v40 }
  0x45   : > { %2957 = vmatprep.mubr.msk.f32.mxu0 %vm540_vm0, %v425_v50  ;;  %v472_v50 = vld [vmem:[%s3699_s25 + $0x1a0] sm:$0xff] }
  0x48   : > { %712 = vmatmul.mubr.f32.gmra.mrb[4].mxu0 %v424_v53  ;;  %v477_v53 = vld [vmem:[%s3699_s25 + $0x1c8] sm:$0xff] }
  0x49   : > { %2958 = vmatprep.mubr.msk.f32.mxu0 %vm540_vm0, %v427_v55  ;;  %v479_v55 = vld [vmem:[%s3699_s25 + $0x1d8] sm:$0xff] }
  0x4c   : > { %717 = vmatmul.mubr.f32.gmra.mrb[6].mxu0 %v426_v58  ;;  %v480_v58 = vld [vmem:[%s3699_s25 + $0x1e0] sm:$0xff] }
  0x4d   : > { %2959 = vmatprep.mubr.msk.f32.mxu0 %vm540_vm0, %v429_v60  ;;  %v482_v60 = vld [vmem:[%s3699_s25 + $0x1f0] sm:$0xff] }
  0x50   : > { %722 = vmatmul.mubr.f32.gmra.mrb[8].mxu0 %v428_v63  ;;  %v3605_v63 = vmov 2  }
  0x51   : > { %2960 = vmatprep.mubr.msk.f32.mxu0 %vm540_vm0, %v431_v1  ;;  %3379 = vset.pattern.permute.xlu0 %v3605_v63  ;;  %v3928_v1 = vadd.f32 1e-06, %v3925_v0 }
  0x52   : > { %3380 = vset.pattern.permute.xlu1 %v3605_v63  ;;  %1972 = vperm.xlu0 %3379, %v3921_v62   ;;  %v4115_v63 = vld [vmem:[%s3915_s10 + $0xd8] sm:$0xff] }
  0x53   : > { %5539 = vst [vmem:[#allocation13_spill] sm:$0xff] %v4115_v63 }
  0x54   : > { %727 = vmatmul.mubr.f32.gmra.mrb[10].mxu0 %v430_v2  ;;  %v3931_v2 = vld [vmem:[%s3915_s10 + $0x10] sm:$0xff] }
  0x55   : > { %2961 = vmatprep.mubr.msk.f32.mxu0 %vm540_vm0, %v433_v3  ;;  %v3934_v3 = vadd.f32 1e-06, %v3931_v2 }
  0x56   : > { %1977 = vperm.xlu0 %3379, %v3928_v1  }
  0x57   : > { %1982 = vperm.xlu1 %3380, %v3934_v3  }
  0x58   : > { %732 = vmatmul.mubr.f32.gmra.mrb[12].mxu0 %v432_v4  ;;  %v3939_v4 = vld [vmem:[%s3915_s10 + $0x20] sm:$0xff] }
  0x59   : > { %2962 = vmatprep.mubr.msk.f32.mxu0 %vm540_vm0, %v435_v5  ;;  %v3942_v5 = vadd.f32 1e-06, %v3939_v4 }
  0x5b   : > { %1992 = vperm.xlu0 %3379, %v3942_v5  }
  0x5c   : > { %737 = vmatmul.mubr.f32.gmra.mrb[14].mxu0 %v434_v6  ;;  %v3945_v6 = vld [vmem:[%s3915_s10 + $0x18] sm:$0xff] }
  0x5d   : > { %2963 = vmatprep.mubr.msk.f32.mxu0 %vm540_vm0, %v437_v7  ;;  %v3948_v7 = vadd.f32 1e-06, %v3945_v6 }
  0x5f   : > { %1987 = vperm.xlu1 %3380, %v3948_v7  }
  0x60   : > { %742 = vmatmul.mubr.f32.gmra.mrb[16].mxu0 %v436_v8  ;;  %v3953_v8 = vld [vmem:[%s3915_s10 + $0x30] sm:$0xff] }
  0x61   : > { %2964 = vmatprep.mubr.msk.f32.mxu0 %vm540_vm0, %v439_v9  ;;  %v3956_v9 = vadd.f32 1e-06, %v3953_v8 }
  0x63   : > { %2002 = vperm.xlu0 %3379, %v3956_v9  }
  0x64   : > { %747 = vmatmul.mubr.f32.gmra.mrb[18].mxu0 %v438_v10  ;;  %v3959_v10 = vld [vmem:[%s3915_s10 + $0x28] sm:$0xff] }
  0x65   : > { %2965 = vmatprep.mubr.msk.f32.mxu0 %vm540_vm0, %v441_v11  ;;  %v3962_v11 = vadd.f32 1e-06, %v3959_v10 }
  0x67   : > { %1997 = vperm.xlu1 %3380, %v3962_v11  }
  0x68   : > { %752 = vmatmul.mubr.f32.gmra.mrb[20].mxu0 %v440_v12  ;;  %v3967_v12 = vld [vmem:[%s3915_s10 + $0x40] sm:$0xff] }
  0x69   : > { %2966 = vmatprep.mubr.msk.f32.mxu0 %vm540_vm0, %v443_v13  ;;  %v3970_v13 = vadd.f32 1e-06, %v3967_v12 }
  0x6b   : > { %2012 = vperm.xlu0 %3379, %v3970_v13  }
  0x6c   : > { %757 = vmatmul.mubr.f32.gmra.mrb[22].mxu0 %v442_v14  ;;  %v3973_v14 = vld [vmem:[%s3915_s10 + $0x38] sm:$0xff] }
  0x6d   : > { %2967 = vmatprep.mubr.msk.f32.mxu0 %vm540_vm0, %v445_v15  ;;  %v3976_v15 = vadd.f32 1e-06, %v3973_v14 }
  0x6f   : > { %2007 = vperm.xlu1 %3380, %v3976_v15  }
  0x70   : > { %762 = vmatmul.mubr.f32.gmra.mrb[24].mxu0 %v444_v16  ;;  %v3981_v16 = vld [vmem:[%s3915_s10 + $0x50] sm:$0xff] }
  0x71   : > { %2968 = vmatprep.mubr.msk.f32.mxu0 %vm540_vm0, %v447_v17  ;;  %v3984_v17 = vadd.f32 1e-06, %v3981_v16 }
  0x73   : > { %2022 = vperm.xlu0 %3379, %v3984_v17  }
  0x74   : > { %767 = vmatmul.mubr.f32.gmra.mrb[26].mxu0 %v446_v18  ;;  %v3987_v18 = vld [vmem:[%s3915_s10 + $0x48] sm:$0xff] }
  0x75   : > { %2969 = vmatprep.mubr.msk.f32.mxu0 %vm540_vm0, %v449_v19  ;;  %v3990_v19 = vadd.f32 1e-06, %v3987_v18 }
  0x77   : > { %2017 = vperm.xlu1 %3380, %v3990_v19  }
  0x78   : > { %772 = vmatmul.mubr.f32.gmra.mrb[28].mxu0 %v448_v20  ;;  %v3995_v20 = vld [vmem:[%s3915_s10 + $0x60] sm:$0xff] }
  0x79   : > { %2970 = vmatprep.mubr.msk.f32.mxu0 %vm540_vm0, %v451_v21  ;;  %v3998_v21 = vadd.f32 1e-06, %v3995_v20 }
  0x7b   : > { %2032 = vperm.xlu0 %3379, %v3998_v21  }
  0x7c   : > { %777 = vmatmul.mubr.f32.gmra.mrb[30].mxu0 %v450_v22  ;;  %v4001_v22 = vld [vmem:[%s3915_s10 + $0x58] sm:$0xff] }
  0x7d   : > { %2971 = vmatprep.mubr.msk.f32.mxu0 %vm540_vm0, %v453_v23  ;;  %v4004_v23 = vadd.f32 1e-06, %v4001_v22 }
  0x7f   : > { %2027 = vperm.xlu1 %3380, %v4004_v23  }
  0x80   : > { %782 = vmatmul.mubr.f32.gmra.mrb[32].mxu0 %v452_v24  ;;  %v4009_v24 = vld [vmem:[%s3915_s10 + $0x70] sm:$0xff] }
  0x81   : > { %2972 = vmatprep.mubr.msk.f32.mxu0 %vm540_vm0, %v455_v25  ;;  %v4012_v25 = vadd.f32 1e-06, %v4009_v24 }
  0x83   : > { %2042 = vperm.xlu0 %3379, %v4012_v25  }
  0x84   : > { %787 = vmatmul.mubr.f32.gmra.mrb[34].mxu0 %v454_v26  ;;  %v4015_v26 = vld [vmem:[%s3915_s10 + $0x68] sm:$0xff] }
  0x85   : > { %2973 = vmatprep.mubr.msk.f32.mxu0 %vm540_vm0, %v457_v27  ;;  %v4018_v27 = vadd.f32 1e-06, %v4015_v26 }
  0x87   : > { %2037 = vperm.xlu1 %3380, %v4018_v27  }
  0x88   : > { %792 = vmatmul.mubr.f32.gmra.mrb[36].mxu0 %v456_v28  ;;  %v4023_v28 = vld [vmem:[%s3915_s10 + $0x80] sm:$0xff] }
  0x89   : > { %2974 = vmatprep.mubr.msk.f32.mxu0 %vm540_vm0, %v459_v29  ;;  %v4026_v29 = vadd.f32 1e-06, %v4023_v28 }
  0x8b   : > { %2052 = vperm.xlu0 %3379, %v4026_v29  }
  0x8c   : > { %797 = vmatmul.mubr.f32.gmra.mrb[38].mxu0 %v458_v30  ;;  %v4029_v30 = vld [vmem:[%s3915_s10 + $0x78] sm:$0xff] }
  0x8d   : > { %2975 = vmatprep.mubr.msk.f32.mxu0 %vm540_vm0, %v461_v31  ;;  %v4032_v31 = vadd.f32 1e-06, %v4029_v30 }
  0x8f   : > { %2047 = vperm.xlu1 %3380, %v4032_v31  }
  0x90   : > { %802 = vmatmul.mubr.f32.gmra.mrb[40].mxu0 %v460_v32  ;;  %v4037_v32 = vld [vmem:[%s3915_s10 + $0x90] sm:$0xff] }
  0x91   : > { %2976 = vmatprep.mubr.msk.f32.mxu0 %vm540_vm0, %v463_v33  ;;  %v4040_v33 = vadd.f32 1e-06, %v4037_v32 }
  0x93   : > { %2062 = vperm.xlu0 %3379, %v4040_v33  }
  0x94   : > { %807 = vmatmul.mubr.f32.gmra.mrb[42].mxu0 %v462_v34  ;;  %v4043_v34 = vld [vmem:[%s3915_s10 + $0x88] sm:$0xff] }
  0x95   : > { %2977 = vmatprep.mubr.msk.f32.mxu0 %vm540_vm0, %v465_v37  ;;  %5529 = vst [vmem:[#allocation3_spill] sm:$0xff] %v4043_v34  ;;  %v4046_v35 = vadd.f32 1e-06, %v4043_v34  ;;  %v4054_v37 = vadd.f32 1e-06, %v4051_v36  ;;  %v1322_v34 = vld [vmem:[%s5480_s6 + $0x50] sm:$0xff] }
  0x97   : > { %2057 = vperm.xlu1 %3380, %v4046_v35   ;;  %2072 = vperm.xlu0 %3379, %v4054_v37  }
  0x98   : > { %812 = vmatmul.mubr.f32.gmra.mrb[44].mxu0 %v464_v39  ;;  %v4060_v39 = vadd.f32 1e-06, %v4057_v38 }
  0x99   : > { %2978 = vmatprep.mubr.msk.f32.mxu0 %vm540_vm0, %v467_v42  ;;  %v4071_v42 = vld [vmem:[%s3915_s10 + $0xa8] sm:$0xff] }
  0x9a   : > { %5533 = vst [vmem:[#allocation7_spill] sm:$0xff] %v4071_v42 }
  0x9b   : > { %2067 = vperm.xlu1 %3380, %v4060_v39   ;;  %2082 = vperm.xlu0 %3379, %v4068_v41  }
  0x9c   : > { %817 = vmatmul.mubr.f32.gmra.mrb[46].mxu0 %v466_v44  ;;  %v4079_v44 = vadd.f32 1e-06, %v4071_v42 }
  0x9d   : > { %2979 = vmatprep.mubr.msk.f32.mxu0 %vm540_vm0, %v469_v45 }
  0x9f   : > { %2077 = vperm.xlu1 %3380, %v4079_v44  }
  0xa0   : > { %822 = vmatmul.mubr.f32.gmra.mrb[48].mxu0 %v468_v46  ;;  %v4084_v46 = vld [vmem:[%s3915_s10 + $0xc0] sm:$0xff] }
  0xa1   : > { %2980 = vmatprep.mubr.msk.f32.mxu0 %vm540_vm0, %v471_v47  ;;  %5534 = vst [vmem:[#allocation8_spill] sm:$0xff] %v4084_v46 }
  0xa4   : > { %827 = vmatmul.mubr.f32.gmra.mrb[50].mxu0 %v470_v48 }
  0xa5   : > { %2981 = vmatprep.mubr.msk.f32.mxu0 %vm540_vm0, %v473_v49  ;;  %v4088_v49 = vadd.f32 1e-06, %v4084_v46  ;;  %v4138_v46 = vld [vmem:[%s3915_s10 + $0xf0] sm:$0xff] }
  0xa6   : > { %5540 = vst [vmem:[#allocation14_spill] sm:$0xff] %v4138_v46 }
  0xa7   : > { %2092 = vperm.xlu0 %3379, %v4088_v49  }
  0xa8   : > { %832 = vmatmul.mubr.f32.gmra.mrb[52].mxu0 %v472_v50  ;;  %v4091_v50 = vld [vmem:[%s3915_s10 + $0xb8] sm:$0xff] }
  0xa9   : > { %2982 = vmatprep.mubr.msk.f32.mxu0 %vm540_vm0, %v475_v51  ;;  %5535 = vst [vmem:[#allocation9_spill] sm:$0xff] %v4091_v50  ;;  %v4094_v51 = vld [vmem:[%s3915_s10 + $0xd0] sm:$0xff] }
  0xaa   : > { %5536 = vst [vmem:[#allocation10_spill] sm:$0xff] %v4094_v51 }
  0xac   : > { %837 = vmatmul.mubr.f32.gmra.mrb[54].mxu0 %v474_v52  ;;  %v4097_v52 = vld [vmem:[%s3915_s10 + $0xc8] sm:$0xff] }
  0xad   : > { %2983 = vmatprep.mubr.msk.f32.mxu0 %vm540_vm0, %v477_v53  ;;  %5537 = vst [vmem:[#allocation11_spill] sm:$0xff] %v4097_v52  ;;  %v4100_v53 = vadd.f32 1e-06, %v4091_v50  ;;  %v4135_v50 = vadd.f32 1e-06, %v4115_v63 }
  0xaf   : > { %2087 = vperm.xlu1 %3380, %v4100_v53  }
  0xb0   : > { %842 = vmatmul.mubr.f32.gmra.mrb[56].mxu0 %v476_v54 }
  0xb1   : > { %2984 = vmatprep.mubr.msk.f32.mxu0 %vm540_vm0, %v479_v55  ;;  %v4104_v55 = vadd.f32 1e-06, %v4094_v51 }
  0xb3   : > { %2102 = vperm.xlu0 %3379, %v4104_v55  }
  0xb4   : > { %847 = vmatmul.mubr.f32.gmra.mrb[58].mxu0 %v478_v56 }
  0xb5   : > { %2985 = vmatprep.mubr.msk.f32.mxu0 %vm540_vm0, %v481_v57  ;;  %v4108_v57 = vadd.f32 1e-06, %v4097_v52 }
  0xb7   : > { %2097 = vperm.xlu1 %3380, %v4108_v57  }
  0xb8   : > { %852 = vmatmul.mubr.f32.gmra.mrb[60].mxu0 %v480_v58  ;;  %v4111_v58 = vld [vmem:[%s3915_s10 + $0xe0] sm:$0xff] }
  0xb9   : > { %2986 = vmatprep.mubr.msk.f32.mxu0 %vm540_vm0, %v483_v59  ;;  %5538 = vst [vmem:[#allocation12_spill] sm:$0xff] %v4111_v58 }
  0xbb   : > { %2107 = vperm.xlu1 %3380, %v4135_v50  }
  0xbc   : > { %857 = vmatmul.mubr.f32.gmra.mrb[62].mxu0 %v482_v60 }
 0x113   : > { %v703_v45 = vpop.f32.mrb[0].mxu0 }
 0x114   : > { %v705_v47 = vpop.f32.mrb[1].mxu0  ;;  %v968_v48 = vadd.f32 %v4076_v43, %v703_v45  ;;  %v1312_v45 = vld [vmem:[%s5480_s6] sm:$0xff] }
 0x115   : > { %v1313_v47 = vld [vmem:[%s5480_s6 + $0x8] sm:$0xff] }
 0x116   : > { %v1000_v54 = vmax.f32 %v968_v48, 0.0  ;;  %v1314_v48 = vld [vmem:[%s5480_s6 + $0x10] sm:$0xff] }
 0x117   : > { %v708_v56 = vpop.f32.mrb[2].mxu0 }
 0x118   : > { %v969_v59 = vadd.f32 %v4076_v43, %v708_v56  ;;  %v710_v60 = vpop.f32.mrb[3].mxu0  ;;  %3121 = vmatprep.mubr.f32.mxu1 %v1000_v54  ;;  %v4128_v54 = vadd.f32 1e-06, %v4111_v58  ;;  %v3317_v56 = vpack.c.bf16 %v1313_v47, %v1312_v45  ;;  %v1317_v45 = vld [vmem:[%s5480_s6 + $0x28] sm:$0xff] }
 0x119   : > { %v1315_v60 = vld [vmem:[%s5480_s6 + $0x18] sm:$0xff] }
 0x11a   : > { %v1001_v52 = vmax.f32 %v969_v59, 0.0  ;;  %v3321_v42 = vpack.c.bf16 %v1315_v60, %v1314_v48  ;;  %v1316_v59 = vld [vmem:[%s5480_s6 + $0x20] sm:$0xff]  ;;  %3318 = vmatprep.subr.bf16.mxu1 %v3317_v56  ;;  %2112 = vperm.xlu0 %3379, %v4128_v54   ;;  %v4152_v48 = vadd.f32 1e-06, %v4138_v46  ;;  %v4166_v46 = vld [vmem:[%s3915_s10 + $0xf8] sm:$0xff] }
 0x11b   : > { %v713_v51 = vpop.f32.mrb[4].mxu0  ;;  %v3325_v60 = vpack.c.bf16 %v1317_v45, %v1316_v59  ;;  %5542 = vst [vmem:[#allocation16_spill] sm:$0xff] %v4166_v46  ;;  %v4171_v36 = vadd.f32 1e-06, %v4166_v46 }
 0x11c   : > { %v970_v47 = vadd.f32 %v4076_v43, %v713_v51  ;;  %v715_v58 = vpop.f32.mrb[5].mxu0  ;;  %3122 = vmatmul.mubr.f32.vlgmr.msra.gmra.mrb[0].mxu1 %v1001_v52  ;;  %v4156_v51 = vadd.f32 1e-06, %v4148_v40  ;;  %v1318_v52 = vld [vmem:[%s5480_s6 + $0x30] sm:$0xff] }
 0x11d   : > { %3320 = vmatpush3.bf16.msra.mxu1 %v3317_v56  ;;  %v1319_v58 = vld [vmem:[%s5480_s6 + $0x38] sm:$0xff] }
 0x11e   : > { %v1002_v63 = vmax.f32 %v970_v47, 0.0  ;;  %3322 = vmatprep.subr.bf16.mxu1 %v3321_v42  ;;  %2122 = vperm.xlu0 %3379, %v4152_v48   ;;  %v3329_v45 = vpack.c.bf16 %v1319_v58, %v1318_v52  ;;  %v3606_v58 = vmov 3  }
 0x11f   : > { %v718_v38 = vpop.f32.mrb[6].mxu0  ;;  %2117 = vperm.xlu1 %3380, %v4156_v51  }
 0x120   : > { %v971_v56 = vadd.f32 %v4076_v43, %v718_v38  ;;  %v720_v47 = vpop.f32.mrb[7].mxu0  ;;  %3124 = vmatprep.mubr.f32.mxu1 %v1002_v63  ;;  %v1320_v38 = vld [vmem:[%s5480_s6 + $0x40] sm:$0xff]  ;;  %v1321_v63 = vld [vmem:[%s5480_s6 + $0x48] sm:$0xff] }
 0x121   : > { %3324 = vmatpush3.bf16.msra.mxu1 %v3321_v42  ;;  %v3333_v47 = vpack.c.bf16 %v1321_v63, %v1320_v38 }
 0x122   : > { %v1003_v59 = vmax.f32 %v971_v56, 0.0  ;;  %3326 = vmatprep.subr.bf16.mxu1 %v3325_v60  ;;  %3381 = vset.pattern.permute.xlu0 %v3606_v58 }
 0x123   : > { %v723_v40 = vpop.f32.mrb[8].mxu0  ;;  %2127 = vperm.xlu1 %3380, %v4171_v36   ;;  %2131 = vperm.xlu0 %3381, %v3921_v62   ;;  %v1324_v62 = vld [vmem:[%s5480_s6 + $0x60] sm:$0xff] }
 0x124   : > { %v972_v42 = vadd.f32 %v4076_v43, %v723_v40  ;;  %v725_v56 = vpop.f32.mrb[9].mxu0  ;;  %3125 = vmatmul.mubr.f32.gmra.mrb[2].mxu1 %v1003_v59  ;;  %v1323_v40 = vld [vmem:[%s5480_s6 + $0x58] sm:$0xff] }
 0x125   : > { %3328 = vmatpush3.bf16.msra.mxu1 %v3325_v60  ;;  %v3337_v38 = vpack.c.bf16 %v1323_v40, %v1322_v34  ;;  %v1325_v56 = vld [vmem:[%s5480_s6 + $0x68] sm:$0xff] }
 0x126   : > { %v1004_v52 = vmax.f32 %v972_v42, 0.0  ;;  %3330 = vmatprep.subr.bf16.mxu1 %v3329_v45 }
 0x127   : > { %v728_v46 = vpop.f32.mrb[10].mxu0  ;;  %3382 = vset.pattern.permute.xlu1 %v3606_v58  ;;  %2143 = vperm.xlu0 %3381, %v3948_v7  }
 0x128   : > { %v973_v60 = vadd.f32 %v4076_v43, %v728_v46  ;;  %v730_v59 = vpop.f32.mrb[11].mxu0  ;;  %3127 = vmatprep.mubr.f32.mxu1 %v1004_v52  ;;  %2135 = vperm.xlu1 %3382, %v3928_v1  }
 0x129   : > { %3332 = vmatpush3.bf16.msra.mxu1 %v3329_v45  ;;  %v3341_v45 = vpack.c.bf16 %v1325_v56, %v1324_v62 }
 0x12a   : > { %v1005_v42 = vmax.f32 %v973_v60, 0.0  ;;  %3334 = vmatprep.subr.bf16.mxu1 %v3333_v47 }
 0x12b   : > { %v733_v63 = vpop.f32.mrb[12].mxu0  ;;  %2151 = vperm.xlu0 %3381, %v3962_v11  }
 0x12c   : > { %v974_v46 = vadd.f32 %v4076_v43, %v733_v63  ;;  %v735_v59 = vpop.f32.mrb[13].mxu0  ;;  %3128 = vmatmul.mubr.f32.gmra.mrb[4].mxu1 %v1005_v42  ;;  %2139 = vperm.xlu1 %3382, %v3934_v3  }
 0x12d   : > { %3336 = vmatpush3.bf16.msra.mxu1 %v3333_v47 }
 0x12e   : > { %v1006_v34 = vmax.f32 %v974_v46, 0.0  ;;  %3338 = vmatprep.subr.bf16.mxu1 %v3337_v38 }
 0x12f   : > { %v738_v52 = vpop.f32.mrb[14].mxu0  ;;  %2159 = vperm.xlu0 %3381, %v3976_v15  }
 0x130   : > { %v975_v7 = vadd.f32 %v4076_v43, %v738_v52  ;;  %v740_v58 = vpop.f32.mrb[15].mxu0  ;;  %3130 = vmatprep.mubr.f32.mxu1 %v1006_v34  ;;  %2147 = vperm.xlu1 %3382, %v3942_v5  }
 0x131   : > { %3340 = vmatpush3.bf16.msra.mxu1 %v3337_v38 }
 0x132   : > { %v1007_v40 = vmax.f32 %v975_v7, 0.0  ;;  %3342 = vmatprep.subr.bf16.mxu1 %v3341_v45 }
 0x133   : > { %v743_v60 = vpop.f32.mrb[16].mxu0  ;;  %2167 = vperm.xlu0 %3381, %v3990_v19  }
 0x134   : > { %v976_v1 = vadd.f32 %v4076_v43, %v743_v60  ;;  %v745_v47 = vpop.f32.mrb[17].mxu0  ;;  %3131 = vmatmul.mubr.f32.gmra.mrb[6].mxu1 %v1007_v40  ;;  %2155 = vperm.xlu1 %3382, %v3956_v9  }
 0x135   : > { %3344 = vmatpush3.bf16.msra.mxu1 %v3341_v45 }
 0x136   : > { %v1008_v11 = vmax.f32 %v976_v1, 0.0 }
 0x137   : > { %v748_v42 = vpop.f32.mrb[18].mxu0  ;;  %2175 = vperm.xlu0 %3381, %v4004_v23  }
 0x138   : > { %v977_v63 = vadd.f32 %v4076_v43, %v748_v42  ;;  %v750_v3 = vpop.f32.mrb[19].mxu0  ;;  %3133 = vmatprep.mubr.f32.mxu1 %v1008_v11  ;;  %2163 = vperm.xlu1 %3382, %v3970_v13  }
 0x13a   : > { %v1009_v38 = vmax.f32 %v977_v63, 0.0 }
 0x13b   : > { %v753_v62 = vpop.f32.mrb[20].mxu0  ;;  %2183 = vperm.xlu0 %3381, %v4018_v27  }
 0x13c   : > { %v978_v15 = vadd.f32 %v4076_v43, %v753_v62  ;;  %v755_v56 = vpop.f32.mrb[21].mxu0  ;;  %3134 = vmatmul.mubr.f32.gmra.mrb[8].mxu1 %v1009_v38  ;;  %2171 = vperm.xlu1 %3382, %v3984_v17  }
 0x13e   : > { %v1010_v5 = vmax.f32 %v978_v15, 0.0 }
 0x13f   : > { %v758_v46 = vpop.f32.mrb[22].mxu0  ;;  %2191 = vperm.xlu0 %3381, %v4032_v31  }
 0x140   : > { %v979_v19 = vadd.f32 %v4076_v43, %v758_v46  ;;  %v760_v59 = vpop.f32.mrb[23].mxu0  ;;  %3136 = vmatprep.mubr.f32.mxu1 %v1010_v5  ;;  %2179 = vperm.xlu1 %3382, %v3998_v21  }
 0x141   : > { %v3607_v59 = vmov 1  }
 0x142   : > { %v1011_v9 = vmax.f32 %v979_v19, 0.0 }
 0x143   : > { %v763_v34 = vpop.f32.mrb[24].mxu0  ;;  %2199 = vperm.xlu0 %3381, %v4046_v35  }
 0x144   : > { %v980_v23 = vadd.f32 %v4076_v43, %v763_v34  ;;  %v765_v45 = vpop.f32.mrb[25].mxu0  ;;  %3137 = vmatmul.mubr.f32.gmra.mrb[10].mxu1 %v1011_v9  ;;  %2187 = vperm.xlu1 %3382, %v4012_v25  }
 0x146   : > { %v1012_v13 = vmax.f32 %v980_v23, 0.0  ;;  %v4253_v23 = vpop.permute.xlu1 %1982 }
 0x147   : > { %v768_v52 = vpop.f32.mrb[26].mxu0  ;;  %2207 = vperm.xlu0 %3381, %v4060_v39  }
 0x148   : > { %v981_v27 = vadd.f32 %v4076_v43, %v768_v52  ;;  %v770_v7 = vpop.f32.mrb[27].mxu0  ;;  %3139 = vmatprep.mubr.f32.mxu1 %v1012_v13  ;;  %2195 = vperm.xlu1 %3382, %v4026_v29   ;;  %v4257_v52 = vmul.f32 1024.0, %v3931_v2 }
 0x149   : > { %v4263_v7 = vmul.f32 1024.0, %v3939_v4 }
 0x14a   : > { %v1013_v17 = vmax.f32 %v981_v27, 0.0 }
 0x14b   : > { %v773_v58 = vpop.f32.mrb[28].mxu0  ;;  %2215 = vperm.xlu0 %3381, %v4079_v44  }
 0x14c   : > { %v982_v31 = vadd.f32 %v4076_v43, %v773_v58  ;;  %v775_v40 = vpop.f32.mrb[29].mxu0  ;;  %3140 = vmatmul.mubr.f32.gmra.mrb[12].mxu1 %v1013_v17  ;;  %2203 = vperm.xlu1 %3382, %v4040_v33   ;;  %v1326_v17 = vld [vmem:[%s5480_s6 + $0x70] sm:$0xff]  ;;  %v1327_v58 = vld [vmem:[%s5480_s6 + $0x78] sm:$0xff] }
 0x14d   : > { %v3345_v40 = vpack.c.bf16 %v1327_v58, %v1326_v17 }
 0x14e   : > { %v1014_v21 = vmax.f32 %v982_v31, 0.0 }
 0x14f   : > { %v778_v60 = vpop.f32.mrb[30].mxu0  ;;  %2223 = vperm.xlu0 %3381, %v4100_v53   ;;  %3346 = vmatprep.subr.bf16.mxu1 %v3345_v40 }
 0x150   : > { %v983_v35 = vadd.f32 %v4076_v43, %v778_v60  ;;  %v780_v1 = vpop.f32.mrb[31].mxu0  ;;  %3142 = vmatprep.mubr.f32.mxu1 %v1014_v21  ;;  %2211 = vperm.xlu1 %3382, %v4054_v37   ;;  %v4272_v21 = vpop.permute.xlu1 %1987 }
 0x151   : > { %3348 = vmatpush3.bf16.msra.mxu1 %v3345_v40  ;;  %v4279_v1 = vmul.f32 1024.0, %v3945_v6  ;;  %v4292_v6 = vmul.f32 1024.0, %v3959_v10  ;;  %v4305_v10 = vmul.f32 1024.0, %v3973_v14  ;;  %v4318_v14 = vmul.f32 1024.0, %v3987_v18 }
 0x152   : > { %v1015_v25 = vmax.f32 %v983_v35, 0.0  ;;  %v4331_v18 = vmul.f32 1024.0, %v4001_v22  ;;  %v4344_v22 = vmul.f32 1024.0, %v4015_v26  ;;  %v4357_v26 = vmul.f32 1024.0, %v4029_v30 }
 0x153   : > { %v783_v47 = vpop.f32.mrb[32].mxu0  ;;  %2231 = vperm.xlu0 %3381, %v4108_v57  }
 0x154   : > { %v984_v39 = vadd.f32 %v4076_v43, %v783_v47  ;;  %v785_v11 = vpop.f32.mrb[33].mxu0  ;;  %3143 = vmatmul.mubr.f32.gmra.mrb[14].mxu1 %v1015_v25  ;;  %2219 = vperm.xlu1 %3382, %v4068_v41   ;;  %v4282_v25 = vmul.f32 1024.0, %v3953_v8  ;;  %v4295_v8 = vmul.f32 1024.0, %v3967_v12  ;;  %v4308_v12 = vmul.f32 1024.0, %v3981_v16 }
 0x155   : > { %v4285_v11 = vpop.permute.xlu1 %1997  ;;  %v4321_v16 = vmul.f32 1024.0, %v3995_v20  ;;  %v4334_v20 = vmul.f32 1024.0, %v4009_v24  ;;  %v4347_v24 = vmul.f32 1024.0, %v4023_v28  ;;  %v4360_v28 = vmul.f32 1024.0, %v4037_v32 }
 0x156   : > { %v1016_v29 = vmax.f32 %v984_v39, 0.0 }
 0x157   : > { %v788_v42 = vpop.f32.mrb[34].mxu0  ;;  %2239 = vperm.xlu0 %3381, %v4135_v50  }
 0x158   : > { %v985_v44 = vadd.f32 %v4076_v43, %v788_v42  ;;  %v790_v63 = vpop.f32.mrb[35].mxu0  ;;  %3145 = vmatprep.mubr.f32.mxu1 %v1016_v29  ;;  %2227 = vperm.xlu1 %3382, %v4088_v49   ;;  %v4240_v49 = vpop.permute.xlu0 %1972 }
 0x15a   : > { %v1017_v33 = vmax.f32 %v985_v44, 0.0 }
 0x15b   : > { %v793_v3 = vpop.f32.mrb[36].mxu0  ;;  %2247 = vperm.xlu0 %3381, %v4156_v51   ;;  %v4243_v51 = vmul.f32 1024.0, %v3925_v0 }
 0x15c   : > { %v986_v53 = vadd.f32 %v4076_v43, %v793_v3  ;;  %v795_v38 = vpop.f32.mrb[37].mxu0  ;;  %3146 = vmatmul.mubr.f32.gmra.mrb[16].mxu1 %v1017_v33  ;;  %2235 = vperm.xlu1 %3382, %v4104_v55   ;;  %v4250_v34 = vpop.permute.xlu0 %1977 }
 0x15d   : > { %v4298_v3 = vpop.permute.xlu1 %2007 }
 0x15e   : > { %v1018_v37 = vmax.f32 %v986_v53, 0.0 }
 0x15f   : > { %v798_v62 = vpop.f32.mrb[38].mxu0  ;;  %2255 = vperm.xlu0 %3381, %v4171_v36   ;;  %v4248_v36 = vmul.f32 1024.0, %v3918_v61 }
 0x160   : > { %v987_v57 = vadd.f32 %v4076_v43, %v798_v62  ;;  %v800_v15 = vpop.f32.mrb[39].mxu0  ;;  %3148 = vmatprep.mubr.f32.mxu1 %v1018_v37  ;;  %2243 = vperm.xlu1 %3382, %v4128_v54   ;;  %v4260_v61 = vpop.permute.xlu0 %1992 }
 0x161   : > { %v4311_v15 = vpop.permute.xlu1 %2017 }
 0x162   : > { %v1019_v41 = vmax.f32 %v987_v57, 0.0  ;;  %5546 = vst [vmem:[#allocation20_spill] sm:$0xff] %v4311_v15 }
 0x163   : > { %v803_v56 = vpop.f32.mrb[40].mxu0  ;;  %3384 = vset.pattern.permute.xlu0 %v3607_v59 }
 0x164   : > { %v988_v50 = vadd.f32 %v4076_v43, %v803_v56  ;;  %v805_v5 = vpop.f32.mrb[41].mxu0  ;;  %3149 = vmatmul.mubr.f32.gmra.mrb[18].mxu1 %v1019_v41  ;;  %2251 = vperm.xlu1 %3382, %v4152_v48   ;;  %v4276_v60 = vpop.permute.xlu0 %2002 }
 0x165   : > { %2334 = vperm.xlu0 %3384, %v4243_v51   ;;  %5543 = vst [vmem:[#allocation17_spill] sm:$0xff] %v4276_v60 }
 0x166   : > { %v1020_v46 = vmax.f32 %v988_v50, 0.0 }
 0x167   : > { %v808_v19 = vpop.f32.mrb[42].mxu0 }
 0x168   : > { %v989_v55 = vadd.f32 %v4076_v43, %v808_v19  ;;  %v810_v9 = vpop.f32.mrb[43].mxu0  ;;  %3151 = vmatprep.mubr.f32.mxu1 %v1020_v46  ;;  %3383 = vset.pattern.permute.xlu1 %v3607_v59  ;;  %v4289_v42 = vpop.permute.xlu0 %2012 }
 0x169   : > { %2329 = vperm.xlu1 %3383, %v4248_v36   ;;  %2349 = vperm.xlu0 %3384, %v4263_v7   ;;  %5544 = vst [vmem:[#allocation18_spill] sm:$0xff] %v4289_v42  ;;  %v4324_v19 = vpop.permute.xlu1 %2027 }
 0x16a   : > { %v1021_v54 = vmax.f32 %v989_v55, 0.0  ;;  %5548 = vst [vmem:[#allocation22_spill] sm:$0xff] %v4324_v19 }
 0x16b   : > { %v813_v0 = vpop.f32.mrb[44].mxu0 }
 0x16c   : > { %v990_v45 = vadd.f32 %v4076_v43, %v813_v0  ;;  %v815_v13 = vpop.f32.mrb[45].mxu0  ;;  %3152 = vmatmul.mubr.f32.gmra.mrb[20].mxu1 %v1021_v54  ;;  %v4302_v38 = vpop.permute.xlu0 %2022 }
 0x16d   : > { %2339 = vperm.xlu1 %3383, %v4257_v52   ;;  %2359 = vperm.xlu0 %3384, %v4282_v25   ;;  %5545 = vst [vmem:[#allocation19_spill] sm:$0xff] %v4302_v38 }
 0x16e   : > { %v1022_v48 = vmax.f32 %v990_v45, 0.0  ;;  %v4337_v45 = vpop.permute.xlu1 %2037 }
 0x16f   : > { %v818_v27 = vpop.f32.mrb[46].mxu0  ;;  %5550 = vst [vmem:[#allocation24_spill] sm:$0xff] %v4337_v45  ;;  %v5581_v45 = vld [vmem:[#allocation16_spill] sm:$0xff] }
 0x170   : > { %v991_v2 = vadd.f32 %v4076_v43, %v818_v27  ;;  %v820_v31 = vpop.f32.mrb[47].mxu0  ;;  %3154 = vmatprep.mubr.f32.mxu1 %v1022_v48  ;;  %v4315_v56 = vpop.permute.xlu0 %2032  ;;  %v4452_v38 = vmul.f32 1024.0, %v5581_v45 }
 0x171   : > { %2344 = vperm.xlu1 %3383, %v4279_v1   ;;  %2369 = vperm.xlu0 %3384, %v4295_v8   ;;  %5547 = vst [vmem:[#allocation21_spill] sm:$0xff] %v4315_v56 }
 0x172   : > { %v1023_v4 = vmax.f32 %v991_v2, 0.0  ;;  %v4350_v2 = vpop.permute.xlu1 %2047 }
 0x173   : > { %v823_v35 = vpop.f32.mrb[48].mxu0  ;;  %5552 = vst [vmem:[#allocation26_spill] sm:$0xff] %v4350_v2 }
 0x174   : > { %v992_v47 = vadd.f32 %v4076_v43, %v823_v35  ;;  %v825_v39 = vpop.f32.mrb[49].mxu0  ;;  %3155 = vmatmul.mubr.f32.gmra.mrb[22].mxu1 %v1023_v4  ;;  %v4328_v55 = vpop.permute.xlu0 %2042 }
 0x175   : > { %2354 = vperm.xlu1 %3383, %v4292_v6   ;;  %2379 = vperm.xlu0 %3384, %v4308_v12   ;;  %5549 = vst [vmem:[#allocation23_spill] sm:$0xff] %v4328_v55 }
 0x176   : > { %v1024_v29 = vmax.f32 %v992_v47, 0.0  ;;  %v4363_v39 = vpop.permute.xlu1 %2057 }
 0x177   : > { %v828_v44 = vpop.f32.mrb[50].mxu0  ;;  %5554 = vst [vmem:[#allocation28_spill] sm:$0xff] %v4363_v39 }
 0x178   : > { %v993_v63 = vadd.f32 %v4076_v43, %v828_v44  ;;  %v830_v33 = vpop.f32.mrb[51].mxu0  ;;  %3157 = vmatprep.mubr.f32.mxu1 %v1024_v29  ;;  %v4341_v48 = vpop.permute.xlu0 %2052 }
 0x179   : > { %2364 = vperm.xlu1 %3383, %v4305_v10   ;;  %2389 = vperm.xlu0 %3384, %v4321_v16   ;;  %5551 = vst [vmem:[#allocation25_spill] sm:$0xff] %v4341_v48  ;;  %v5556_v33 = vld [vmem:[#allocation3_spill] sm:$0xff] }
 0x17a   : > { %v1025_v53 = vmax.f32 %v993_v63, 0.0  ;;  %v4370_v30 = vmul.f32 1024.0, %v5556_v33 }
 0x17b   : > { %v833_v37 = vpop.f32.mrb[52].mxu0 }
 0x17c   : > { %v994_v62 = vadd.f32 %v4076_v43, %v833_v37  ;;  %v835_v57 = vpop.f32.mrb[53].mxu0  ;;  %3158 = vmatmul.mubr.f32.gmra.mrb[24].mxu1 %v1025_v53  ;;  %v4354_v40 = vpop.permute.xlu0 %2062  ;;  %v5557_v53 = vld [vmem:[#allocation4_spill] sm:$0xff] }
 0x17d   : > { %2374 = vperm.xlu1 %3383, %v4318_v14   ;;  %2399 = vperm.xlu0 %3384, %v4334_v20   ;;  %5553 = vst [vmem:[#allocation27_spill] sm:$0xff] %v4354_v40  ;;  %v4373_v32 = vmul.f32 1024.0, %v5557_v53  ;;  %v4376_v57 = vpop.permute.xlu1 %2067  ;;  %v5572_v53 = vld [vmem:[#allocation11_spill] sm:$0xff] }
 0x17e   : > { %v1026_v41 = vmax.f32 %v994_v62, 0.0  ;;  %5558 = vst [vmem:[#allocation3_spill] sm:$0xff] %v4376_v57 }
 0x17f   : > { %v838_v50 = vpop.f32.mrb[54].mxu0 }
 0x180   : > { %v995_v5 = vadd.f32 %v4076_v43, %v838_v50  ;;  %v840_v46 = vpop.f32.mrb[55].mxu0  ;;  %3160 = vmatprep.mubr.f32.mxu1 %v1026_v41  ;;  %v4367_v44 = vpop.permute.xlu0 %2072 }
 0x181   : > { %2384 = vperm.xlu1 %3383, %v4331_v18   ;;  %2409 = vperm.xlu0 %3384, %v4347_v24   ;;  %5555 = vst [vmem:[#allocation29_spill] sm:$0xff] %v4367_v44 }
 0x182   : > { %v1027_v59 = vmax.f32 %v995_v5, 0.0  ;;  %v5560_v5 = vld [vmem:[#allocation5_spill] sm:$0xff] }
 0x183   : > { %v843_v9 = vpop.f32.mrb[56].mxu0  ;;  %v4383_v46 = vmul.f32 1024.0, %v5560_v5 }
 0x184   : > { %v996_v54 = vadd.f32 %v4076_v43, %v843_v9  ;;  %v845_v0 = vpop.f32.mrb[57].mxu0  ;;  %3161 = vmatmul.mubr.f32.gmra.mrb[26].mxu1 %v1027_v59  ;;  %v4380_v50 = vpop.permute.xlu0 %2082  ;;  %v5561_v59 = vld [vmem:[#allocation6_spill] sm:$0xff] }
 0x185   : > { %2394 = vperm.xlu1 %3383, %v4344_v22   ;;  %2419 = vperm.xlu0 %3384, %v4360_v28   ;;  %5559 = vst [vmem:[#allocation4_spill] sm:$0xff] %v4380_v50  ;;  %v4386_v9 = vmul.f32 1024.0, %v5561_v59  ;;  %v5564_v0 = vld [vmem:[#allocation7_spill] sm:$0xff] }
 0x186   : > { %v1028_v13 = vmax.f32 %v996_v54, 0.0  ;;  %v4388_v54 = vpop.permute.xlu1 %2077 }
 0x187   : > { %v848_v27 = vpop.f32.mrb[58].mxu0  ;;  %5562 = vst [vmem:[#allocation5_spill] sm:$0xff] %v4388_v54 }
 0x188   : > { %v997_v17 = vadd.f32 %v4076_v43, %v848_v27  ;;  %v850_v58 = vpop.f32.mrb[59].mxu0  ;;  %3163 = vmatprep.mubr.f32.mxu1 %v1028_v13  ;;  %v4395_v13 = vmul.f32 1024.0, %v5564_v0  ;;  %v5565_v27 = vld [vmem:[#allocation8_spill] sm:$0xff]  ;;  %v5576_v0 = vld [vmem:[#allocation13_spill] sm:$0xff] }
 0x189   : > { %2404 = vperm.xlu1 %3383, %v4357_v26   ;;  %2429 = vperm.xlu0 %3384, %v4373_v32  }
 0x18a   : > { %v1029_v31 = vmax.f32 %v997_v17, 0.0  ;;  %v4398_v17 = vmul.f32 1024.0, %v5565_v27  ;;  %v4400_v58 = vpop.permute.xlu1 %2087  ;;  %v4431_v27 = vmul.f32 1024.0, %v5576_v0  ;;  %v3608_v0 = vmov 0  }
 0x18b   : > { %v853_v4 = vpop.f32.mrb[60].mxu0  ;;  %5566 = vst [vmem:[#allocation7_spill] sm:$0xff] %v4400_v58 }
 0x18c   : > { %v998_v35 = vadd.f32 %v4076_v43, %v853_v4  ;;  %v855_v47 = vpop.f32.mrb[61].mxu0  ;;  %3164 = vmatmul.mubr.f32.gmra.mrb[28].mxu1 %v1029_v31  ;;  %v5568_v4 = vld [vmem:[#allocation9_spill] sm:$0xff] }
 0x18d   : > { %2414 = vperm.xlu1 %3383, %v4370_v30   ;;  %2439 = vperm.xlu0 %3384, %v4386_v9   ;;  %v5569_v47 = vld [vmem:[#allocation10_spill] sm:$0xff] }
 0x18e   : > { %v1030_v29 = vmax.f32 %v998_v35, 0.0  ;;  %v4407_v35 = vmul.f32 1024.0, %v5568_v4  ;;  %v5577_v4 = vld [vmem:[#allocation14_spill] sm:$0xff] }
 0x18f   : > { %v858_v63 = vpop.f32.mrb[62].mxu0 }
 0x190   : > { %v999_v37 = vadd.f32 %v4076_v43, %v858_v63  ;;  %v860_v62 = vpop.f32.mrb[63].mxu0  ;;  %3166 = vmatprep.mubr.f32.mxu1 %v1030_v29  ;;  %v4392_v43 = vpop.permute.xlu0 %2092  ;;  %v4410_v29 = vmul.f32 1024.0, %v5569_v47  ;;  %v4434_v47 = vmul.f32 1024.0, %v5577_v4 }
 0x191   : > { %2424 = vperm.xlu1 %3383, %v4383_v46   ;;  %5563 = vst [vmem:[#allocation6_spill] sm:$0xff] %v4392_v43  ;;  %2449 = vperm.xlu0 %3384, %v4398_v17   ;;  %v4412_v63 = vpop.permute.xlu1 %2097  ;;  %v5573_v62 = vld [vmem:[#allocation12_spill] sm:$0xff]  ;;  %v4699_v43 = vld [vmem:[%s5481_s7] ss:$0 sm:$0xff] }
 0x192   : > { %v1031_v41 = vmax.f32 %v999_v37, 0.0  ;;  %5570 = vst [vmem:[#allocation9_spill] sm:$0xff] %v4412_v63  ;;  %v4419_v37 = vmul.f32 1024.0, %v5572_v53 }
 0x194   : > { %3167 = vmatmul.mubr.f32.gmra.mrb[30].mxu1 %v1031_v41  ;;  %v4404_v31 = vpop.permute.xlu0 %2102  ;;  %v4422_v41 = vmul.f32 1024.0, %v5573_v62  ;;  %v5579_v62 = vld [vmem:[#allocation15_spill] sm:$0xff] }
 0x195   : > { %2434 = vperm.xlu1 %3383, %v4395_v13   ;;  %5567 = vst [vmem:[#allocation8_spill] sm:$0xff] %v4404_v31  ;;  %2459 = vperm.xlu0 %3384, %v4410_v29   ;;  %v4424_v5 = vpop.permute.xlu1 %2107  ;;  %v4443_v2 = vmul.f32 1024.0, %v5579_v62 }
 0x196   : > { %5574 = vst [vmem:[#allocation11_spill] sm:$0xff] %v4424_v5 }
 0x199   : > { %2444 = vperm.xlu1 %3383, %v4407_v35   ;;  %v4416_v33 = vpop.permute.xlu0 %2112  ;;  %2469 = vperm.xlu0 %3384, %v4422_v41  }
 0x19a   : > { %5571 = vst [vmem:[#allocation10_spill] sm:$0xff] %v4416_v33 }
 0x19d   : > { %2454 = vperm.xlu1 %3383, %v4419_v37   ;;  %v4428_v59 = vpop.permute.xlu0 %2122  ;;  %2479 = vperm.xlu0 %3384, %v4434_v47  }
 0x19e   : > { %5575 = vst [vmem:[#allocation12_spill] sm:$0xff] %v4428_v59  ;;  %v4436_v55 = vpop.permute.xlu1 %2117 }
 0x19f   : > { %5578 = vst [vmem:[#allocation13_spill] sm:$0xff] %v4436_v55 }
 0x1a1   : > { %2464 = vperm.xlu1 %3383, %v4431_v27   ;;  %3385 = vset.pattern.permute.xlu0 %v3608_v0 }
 0x1a2   : > { %v4440_v53 = vpop.permute.xlu0 %2131  ;;  %v4445_v56 = vpop.permute.xlu1 %2127  ;;  %2522 = vperm.xlu0 %3385, %v4248_v36  }
 0x1a3   : > { %5580 = vst [vmem:[#allocation14_spill] sm:$0xff] %v4445_v56 }
 0x1a5   : > { %2474 = vperm.xlu1 %3383, %v4443_v2  }
 0x1a6   : > { %v4449_v4 = vpop.permute.xlu0 %2143  ;;  %2534 = vperm.xlu0 %3385, %v4279_v1   ;;  %v1560_v1 = vlaneseq }
 0x1a7   : > { %v4454_v19 = vpop.permute.xlu1 %2135 }
 0x1a9   : > { %2484 = vperm.xlu1 %3383, %v4452_v38  }
 0x1aa   : > { %v4458_v62 = vpop.permute.xlu0 %2151  ;;  %2542 = vperm.xlu0 %3385, %v4292_v6   ;;  %v4478_v6 = vand.u32 127, %v1560_v1 }
 0x1ab   : > { %v4460_v42 = vpop.permute.xlu1 %2139 }
 0x1ac   : > { %vm1563_vm2 = vcmp.ge.s32.totalorder %v4478_v6, 4  ;;  %vm1564_vm3 = vcmp.le.s32.totalorder %v4478_v6, 12  ;;  %vm1562_vm4 = vcmp.lt.s32.totalorder %v4478_v6, 2  ;;  %vm2324_vm7 = vcmp.eq.s32.totalorder %v4478_v6, 1 }
 0x1ad   : > { %3386 = vset.pattern.permute.xlu1 %v3608_v0  ;;  %vm1565_vm5 = vmand %vm1563_vm2, %vm1564_vm3  ;;  %vm2290_vm8 = vcmp.eq.s32.totalorder %v4478_v6, 0  ;;  %vm2777_vm9 = vcmp.lt.s32.totalorder %v4478_v6, 4 }
 0x1ae   : > { %2526 = vperm.xlu1 %3386, %v4243_v51   ;;  %v4464_v36 = vpop.permute.xlu0 %2159  ;;  %2550 = vperm.xlu0 %3385, %v4305_v10   ;;  %v1959_v10 = vand.u32 1, %v4478_v6  ;;  %vm4757_vm6 = vmor %vm1562_vm4, %vm1565_vm5 }
 0x1af   : > { %v4466_v15 = vpop.permute.xlu1 %2147 }
 0x1b0   : > { %vm4493_vm1 = vcmp.eq.s32.totalorder %v1959_v10, 0 }
 0x1b1   : > { %v2259_v48 = vsel %vm4493_vm1, %v4250_v34, %v4454_v19  ;;  %v3609_v19 = vmov 1024.0  }
 0x1b2   : > { %2530 = vperm.xlu1 %3386, %v4257_v52   ;;  %v4470_v45 = vpop.permute.xlu0 %2167  ;;  %2558 = vperm.xlu0 %3385, %v4318_v14  }
 0x1b3   : > { %5582 = vst [vmem:[#allocation15_spill] sm:$0xff] %v4470_v45  ;;  %v4472_v60 = vpop.permute.xlu1 %2155 }
 0x1b6   : > { %2538 = vperm.xlu1 %3386, %v4263_v7   ;;  %v4476_v51 = vpop.permute.xlu0 %2175  ;;  %2566 = vperm.xlu0 %3385, %v4331_v18  }
 0x1b7   : > { %v4480_v0 = vpop.permute.xlu1 %2163 }
 0x1ba   : > { %2546 = vperm.xlu1 %3386, %v4282_v25   ;;  %v4484_v52 = vpop.permute.xlu0 %2183  ;;  %2574 = vperm.xlu0 %3385, %v4344_v22  }
 0x1bb   : > { %v4487_v45 = vpop.permute.xlu1 %2171 }
 0x1be   : > { %2554 = vperm.xlu1 %3386, %v4295_v8   ;;  %v4491_v7 = vpop.permute.xlu0 %2191  ;;  %2582 = vperm.xlu0 %3385, %v4357_v26  }
 0x1bf   : > { %v4497_v1 = vpop.permute.xlu1 %2179 }
 0x1c2   : > { %2562 = vperm.xlu1 %3386, %v4308_v12   ;;  %v4501_v25 = vpop.permute.xlu0 %2199  ;;  %2590 = vperm.xlu0 %3385, %v4370_v30   ;;  %v4619_v30 = vld [vmem:[%s5479_s5] ss:$0 sm:$0xff] }
 0x1c3   : > { %5585 = vst [vmem:[#allocation16_spill] sm:$0xff] %v4501_v25  ;;  %v4507_v18 = vpop.permute.xlu1 %2187 }
 0x1c6   : > { %2570 = vperm.xlu1 %3386, %v4321_v16   ;;  %v4511_v22 = vpop.permute.xlu0 %2207  ;;  %2598 = vperm.xlu0 %3385, %v4383_v46  }
 0x1c7   : > { %5586 = vst [vmem:[#allocation30_spill] sm:$0xff] %v4511_v22  ;;  %v4517_v26 = vpop.permute.xlu1 %2195 }
 0x1c8   : > { %5587 = vst [vmem:[#allocation31_spill] sm:$0xff] %v4517_v26 }
 0x1ca   : > { %2578 = vperm.xlu1 %3386, %v4334_v20   ;;  %v4525_v16 = vpop.permute.xlu0 %2215  ;;  %2606 = vperm.xlu0 %3385, %v4395_v13  }
 0x1cb   : > { %5588 = vst [vmem:[#allocation32_spill] sm:$0xff] %v4525_v16  ;;  %v4531_v8 = vpop.permute.xlu1 %2203 }
 0x1cc   : > { %5589 = vst [vmem:[#allocation33_spill] sm:$0xff] %v4531_v8 }
 0x1ce   : > { %2586 = vperm.xlu1 %3386, %v4347_v24   ;;  %v4535_v12 = vpop.permute.xlu0 %2223  ;;  %2614 = vperm.xlu0 %3385, %v4407_v35  }
 0x1cf   : > { %5590 = vst [vmem:[#allocation34_spill] sm:$0xff] %v4535_v12  ;;  %v4545_v10 = vpop.permute.xlu1 %2211 }
 0x1d0   : > { %5591 = vst [vmem:[#allocation35_spill] sm:$0xff] %v4545_v10 }
 0x1d2   : > { %2594 = vperm.xlu1 %3386, %v4360_v28   ;;  %v4553_v13 = vpop.permute.xlu0 %2231  ;;  %2622 = vperm.xlu0 %3385, %v4419_v37  }
 0x1d3   : > { %5592 = vst [vmem:[#allocation36_spill] sm:$0xff] %v4553_v13  ;;  %v4559_v20 = vpop.permute.xlu1 %2219 }
 0x1d4   : > { %5593 = vst [vmem:[#allocation37_spill] sm:$0xff] %v4559_v20 }
 0x1d6   : > { %2602 = vperm.xlu1 %3386, %v4373_v32   ;;  %v4563_v46 = vpop.permute.xlu0 %2239  ;;  %2630 = vperm.xlu0 %3385, %v4431_v27  }
 0x1d7   : > { %5594 = vst [vmem:[#allocation38_spill] sm:$0xff] %v4563_v46  ;;  %v4573_v24 = vpop.permute.xlu1 %2227 }
 0x1d8   : > { %5595 = vst [vmem:[#allocation39_spill] sm:$0xff] %v4573_v24 }
 0x1da   : > { %2610 = vperm.xlu1 %3386, %v4386_v9   ;;  %v4581_v37 = vpop.permute.xlu0 %2247  ;;  %2638 = vperm.xlu0 %3385, %v4443_v2  }
 0x1db   : > { %5596 = vst [vmem:[#allocation40_spill] sm:$0xff] %v4581_v37  ;;  %v4587_v28 = vpop.permute.xlu1 %2235 }
 0x1dc   : > { %5597 = vst [vmem:[#allocation41_spill] sm:$0xff] %v4587_v28 }
 0x1de   : > { %2618 = vperm.xlu1 %3386, %v4398_v17   ;;  %v4591_v35 = vpop.permute.xlu0 %2255  ;;  %2646 = vperm.xlu0 %3385, %v4452_v38  }
 0x1df   : > { %5598 = vst [vmem:[#allocation42_spill] sm:$0xff] %v4591_v35  ;;  %v4601_v32 = vpop.permute.xlu1 %2243 }
 0x1e0   : > { %5599 = vst [vmem:[#allocation43_spill] sm:$0xff] %v4601_v32 }
 0x1e2   : > { %2626 = vperm.xlu1 %3386, %v4410_v29  }
 0x1e3   : > { %v4609_v2 = vpop.permute.xlu1 %2251 }
 0x1e4   : > { %5600 = vst [vmem:[#allocation44_spill] sm:$0xff] %v4609_v2 }
 0x1e6   : > { %2634 = vperm.xlu1 %3386, %v4422_v41  }
 0x1ea   : > { %2642 = vperm.xlu1 %3386, %v4434_v47  }
 0x1ef   : > { %v3123_v17 = vpop.f32.mrb[0].mxu1 }
 0x1f0   : > { %v1127_v29 = vadd.f32 %v3123_v17, %v4619_v30  ;;  %v1121_v38 = vpop.f32.mrb[1].mxu1 }
 0x1f1   : > { %v1122_v9 = vadd.f32 %v4619_v30, %v1121_v38 }
 0x1f2   : > { %v1281_v41 = vmax.f32 %v1127_v29, 0.0 }
 0x1f3   : > { %v1280_v35 = vmax.f32 %v1122_v9, 0.0 }
 0x1f5   : > { %3201 = vmatprep.mubr.f32.mxu1 %v1280_v35 }
 0x1f6   : > { %3202 = vmatmul.mubr.f32.vlgmr.msra.gmra.mrb[32].mxu1 %v1281_v41 }
 0x1f7   : > { %v3126_v56 = vpop.f32.mrb[2].mxu1 }
 0x1f8   : > { %v1137_v27 = vadd.f32 %v3126_v56, %v4619_v30  ;;  %v1131_v2 = vpop.f32.mrb[3].mxu1 }
 0x1f9   : > { %v1132_v59 = vadd.f32 %v4619_v30, %v1131_v2 }
 0x1fa   : > { %v1283_v33 = vmax.f32 %v1137_v27, 0.0 }
 0x1fb   : > { %v1282_v32 = vmax.f32 %v1132_v59, 0.0 }
 0x1fd   : > { %3204 = vmatprep.mubr.f32.mxu1 %v1282_v32 }
 0x1fe   : > { %3205 = vmatmul.mubr.f32.gmra.mrb[34].mxu1 %v1283_v33 }
 0x1ff   : > { %v3129_v47 = vpop.f32.mrb[4].mxu1 }
 0x200   : > { %v1147_v17 = vadd.f32 %v3129_v47, %v4619_v30  ;;  %v1141_v37 = vpop.f32.mrb[5].mxu1 }
 0x201   : > { %v1142_v38 = vadd.f32 %v4619_v30, %v1141_v37 }
 0x202   : > { %v1285_v29 = vmax.f32 %v1147_v17, 0.0 }
 0x203   : > { %v1284_v9 = vmax.f32 %v1142_v38, 0.0 }
 0x205   : > { %3207 = vmatprep.mubr.f32.mxu1 %v1284_v9 }
 0x206   : > { %3208 = vmatmul.mubr.f32.gmra.mrb[36].mxu1 %v1285_v29 }
 0x207   : > { %v3132_v35 = vpop.f32.mrb[6].mxu1 }
 0x208   : > { %v1157_v56 = vadd.f32 %v3132_v35, %v4619_v30  ;;  %v1151_v41 = vpop.f32.mrb[7].mxu1 }
 0x209   : > { %v1152_v2 = vadd.f32 %v4619_v30, %v1151_v41 }
 0x20a   : > { %v1287_v27 = vmax.f32 %v1157_v56, 0.0 }
 0x20b   : > { %v1286_v59 = vmax.f32 %v1152_v2, 0.0 }
 0x20d   : > { %3210 = vmatprep.mubr.f32.mxu1 %v1286_v59 }
 0x20e   : > { %3211 = vmatmul.mubr.f32.gmra.mrb[38].mxu1 %v1287_v27 }
 0x20f   : > { %v3135_v33 = vpop.f32.mrb[8].mxu1 }
 0x210   : > { %v1167_v32 = vadd.f32 %v3135_v33, %v4619_v30  ;;  %v1161_v47 = vpop.f32.mrb[9].mxu1 }
 0x211   : > { %v1162_v37 = vadd.f32 %v4619_v30, %v1161_v47 }
 0x212   : > { %v1289_v17 = vmax.f32 %v1167_v32, 0.0 }
 0x213   : > { %v1288_v38 = vmax.f32 %v1162_v37, 0.0 }
 0x215   : > { %3213 = vmatprep.mubr.f32.mxu1 %v1288_v38 }
 0x216   : > { %3214 = vmatmul.mubr.f32.gmra.mrb[40].mxu1 %v1289_v17 }
 0x217   : > { %v3138_v9 = vpop.f32.mrb[10].mxu1 }
 0x218   : > { %v1177_v29 = vadd.f32 %v3138_v9, %v4619_v30  ;;  %v1171_v35 = vpop.f32.mrb[11].mxu1 }
 0x219   : > { %v1172_v41 = vadd.f32 %v4619_v30, %v1171_v35 }
 0x21a   : > { %v1291_v56 = vmax.f32 %v1177_v29, 0.0 }
 0x21b   : > { %v1290_v2 = vmax.f32 %v1172_v41, 0.0 }
 0x21d   : > { %3216 = vmatprep.mubr.f32.mxu1 %v1290_v2 }
 0x21e   : > { %3217 = vmatmul.mubr.f32.gmra.mrb[42].mxu1 %v1291_v56 }
 0x21f   : > { %v3141_v59 = vpop.f32.mrb[12].mxu1 }
 0x220   : > { %v1187_v27 = vadd.f32 %v3141_v59, %v4619_v30  ;;  %v1181_v33 = vpop.f32.mrb[13].mxu1 }
 0x221   : > { %v1182_v47 = vadd.f32 %v4619_v30, %v1181_v33 }
 0x222   : > { %v1293_v32 = vmax.f32 %v1187_v27, 0.0 }
 0x223   : > { %v1292_v37 = vmax.f32 %v1182_v47, 0.0 }
 0x225   : > { %3219 = vmatprep.mubr.f32.mxu1 %v1292_v37 }
 0x226   : > { %3220 = vmatmul.mubr.f32.gmra.mrb[44].mxu1 %v1293_v32 }
 0x227   : > { %v3144_v38 = vpop.f32.mrb[14].mxu1 }
 0x228   : > { %v1197_v17 = vadd.f32 %v3144_v38, %v4619_v30  ;;  %v1191_v9 = vpop.f32.mrb[15].mxu1 }
 0x229   : > { %v1192_v35 = vadd.f32 %v4619_v30, %v1191_v9 }
 0x22a   : > { %v1295_v29 = vmax.f32 %v1197_v17, 0.0 }
 0x22b   : > { %v1294_v41 = vmax.f32 %v1192_v35, 0.0 }
 0x22d   : > { %3222 = vmatprep.mubr.f32.mxu1 %v1294_v41 }
 0x22e   : > { %3223 = vmatmul.mubr.f32.gmra.mrb[46].mxu1 %v1295_v29 }
 0x22f   : > { %v3147_v2 = vpop.f32.mrb[16].mxu1 }
 0x230   : > { %v1207_v56 = vadd.f32 %v3147_v2, %v4619_v30  ;;  %v1201_v59 = vpop.f32.mrb[17].mxu1 }
 0x231   : > { %v1202_v33 = vadd.f32 %v4619_v30, %v1201_v59 }
 0x232   : > { %v1297_v27 = vmax.f32 %v1207_v56, 0.0 }
 0x233   : > { %v1296_v47 = vmax.f32 %v1202_v33, 0.0 }
 0x235   : > { %3225 = vmatprep.mubr.f32.mxu1 %v1296_v47 }
 0x236   : > { %3226 = vmatmul.mubr.f32.gmra.mrb[48].mxu1 %v1297_v27 }
 0x237   : > { %v3150_v37 = vpop.f32.mrb[18].mxu1 }
 0x238   : > { %v1217_v32 = vadd.f32 %v3150_v37, %v4619_v30  ;;  %v1211_v38 = vpop.f32.mrb[19].mxu1 }
 0x239   : > { %v1212_v9 = vadd.f32 %v4619_v30, %v1211_v38 }
 0x23a   : > { %v1299_v17 = vmax.f32 %v1217_v32, 0.0 }
 0x23b   : > { %v1298_v35 = vmax.f32 %v1212_v9, 0.0 }
 0x23d   : > { %3228 = vmatprep.mubr.f32.mxu1 %v1298_v35 }
 0x23e   : > { %3229 = vmatmul.mubr.f32.gmra.mrb[50].mxu1 %v1299_v17 }
 0x23f   : > { %v3153_v41 = vpop.f32.mrb[20].mxu1 }
 0x240   : > { %v1227_v29 = vadd.f32 %v3153_v41, %v4619_v30  ;;  %v1221_v2 = vpop.f32.mrb[21].mxu1 }
 0x241   : > { %v1222_v59 = vadd.f32 %v4619_v30, %v1221_v2 }
 0x242   : > { %v1301_v56 = vmax.f32 %v1227_v29, 0.0 }
 0x243   : > { %v1300_v33 = vmax.f32 %v1222_v59, 0.0 }
 0x245   : > { %3231 = vmatprep.mubr.f32.mxu1 %v1300_v33 }
 0x246   : > { %3232 = vmatmul.mubr.f32.gmra.mrb[52].mxu1 %v1301_v56 }
 0x247   : > { %v3156_v47 = vpop.f32.mrb[22].mxu1 }
 0x248   : > { %v1237_v27 = vadd.f32 %v3156_v47, %v4619_v30  ;;  %v1231_v37 = vpop.f32.mrb[23].mxu1 }
 0x249   : > { %v1232_v38 = vadd.f32 %v4619_v30, %v1231_v37 }
 0x24a   : > { %v1303_v32 = vmax.f32 %v1237_v27, 0.0 }
 0x24b   : > { %v1302_v9 = vmax.f32 %v1232_v38, 0.0 }
 0x24d   : > { %3234 = vmatprep.mubr.f32.mxu1 %v1302_v9 }
 0x24e   : > { %3235 = vmatmul.mubr.f32.gmra.mrb[54].mxu1 %v1303_v32 }
 0x24f   : > { %v3159_v35 = vpop.f32.mrb[24].mxu1 }
 0x250   : > { %v1247_v17 = vadd.f32 %v3159_v35, %v4619_v30  ;;  %v1241_v41 = vpop.f32.mrb[25].mxu1 }
 0x251   : > { %v1242_v2 = vadd.f32 %v4619_v30, %v1241_v41 }
 0x252   : > { %v1305_v29 = vmax.f32 %v1247_v17, 0.0 }
 0x253   : > { %v1304_v59 = vmax.f32 %v1242_v2, 0.0 }
 0x255   : > { %3237 = vmatprep.mubr.f32.mxu1 %v1304_v59 }
 0x256   : > { %3238 = vmatmul.mubr.f32.gmra.mrb[56].mxu1 %v1305_v29 }
 0x257   : > { %v3162_v33 = vpop.f32.mrb[26].mxu1 }
 0x258   : > { %v1257_v56 = vadd.f32 %v3162_v33, %v4619_v30  ;;  %v1251_v47 = vpop.f32.mrb[27].mxu1 }
 0x259   : > { %v1252_v37 = vadd.f32 %v4619_v30, %v1251_v47 }
 0x25a   : > { %v1307_v27 = vmax.f32 %v1257_v56, 0.0 }
 0x25b   : > { %v1306_v38 = vmax.f32 %v1252_v37, 0.0 }
 0x25d   : > { %3240 = vmatprep.mubr.f32.mxu1 %v1306_v38  ;;  %v4654_v38 = vpop.permute.xlu1 %2329 }
 0x25e   : > { %3241 = vmatmul.mubr.f32.gmra.mrb[58].mxu1 %v1307_v27 }
 0x25f   : > { %v3165_v9 = vpop.f32.mrb[28].mxu1 }
 0x260   : > { %v1267_v32 = vadd.f32 %v3165_v9, %v4619_v30  ;;  %v1261_v35 = vpop.f32.mrb[29].mxu1 }
 0x261   : > { %v1262_v41 = vadd.f32 %v4619_v30, %v1261_v35  ;;  %v4656_v27 = vpop.permute.xlu1 %2339  ;;  %v4660_v35 = vpop.permute.xlu0 %2334 }
 0x262   : > { %v1309_v17 = vmax.f32 %v1267_v32, 0.0  ;;  %v2488_v39 = vsel %vm2324_vm7, %v4660_v35, 0.0 }
 0x263   : > { %v1308_v2 = vmax.f32 %v1262_v41, 0.0 }
 0x265   : > { %3243 = vmatprep.mubr.f32.mxu1 %v1308_v2  ;;  %v4658_v9 = vpop.permute.xlu1 %2344  ;;  %v4664_v41 = vpop.permute.xlu0 %2349 }
 0x266   : > { %3244 = vmatmul.mubr.f32.gmra.mrb[60].mxu1 %v1309_v17 }
 0x267   : > { %v3168_v59 = vpop.f32.mrb[30].mxu1 }
 0x268   : > { %v1277_v29 = vadd.f32 %v3168_v59, %v4619_v30  ;;  %v1271_v33 = vpop.f32.mrb[31].mxu1 }
 0x269   : > { %v1272_v47 = vadd.f32 %v4619_v30, %v1271_v33  ;;  %v4662_v32 = vpop.permute.xlu1 %2354  ;;  %v4668_v17 = vpop.permute.xlu0 %2359 }
 0x26a   : > { %v1311_v56 = vmax.f32 %v1277_v29, 0.0 }
 0x26b   : > { %v1310_v37 = vmax.f32 %v1272_v47, 0.0 }
 0x26d   : > { %3246 = vmatprep.mubr.f32.mxu1 %v1310_v37  ;;  %v4666_v2 = vpop.permute.xlu1 %2364  ;;  %v4672_v59 = vpop.permute.xlu0 %2369 }
 0x26e   : > { %3247 = vmatmul.mubr.f32.gmra.mrb[62].mxu1 %v1311_v56 }
 0x271   : > { %v4670_v30 = vpop.permute.xlu1 %2374  ;;  %v4676_v33 = vpop.permute.xlu0 %2379 }
 0x275   : > { %v4674_v29 = vpop.permute.xlu1 %2384  ;;  %v4680_v37 = vpop.permute.xlu0 %2389 }
 0x279   : > { %v4678_v47 = vpop.permute.xlu1 %2394  ;;  %v4684_v55 = vpop.permute.xlu0 %2399 }
 0x27a   : > { %5602 = vst [vmem:[#allocation46_spill] sm:$0xff] %v4684_v55 }
 0x27d   : > { %v4682_v56 = vpop.permute.xlu1 %2404  ;;  %v4688_v31 = vpop.permute.xlu0 %2409 }
 0x27e   : > { %5601 = vst [vmem:[#allocation45_spill] sm:$0xff] %v4682_v56  ;;  %5604 = vst [vmem:[#allocation48_spill] sm:$0xff] %v4688_v31  ;;  %v2260_v56 = vsel %vm4493_vm1, %v4253_v23, %v4460_v42 }
 0x281   : > { %v4686_v28 = vpop.permute.xlu1 %2414  ;;  %v4692_v5 = vpop.permute.xlu0 %2419 }
 0x282   : > { %5603 = vst [vmem:[#allocation47_spill] sm:$0xff] %v4686_v28  ;;  %5606 = vst [vmem:[#allocation50_spill] sm:$0xff] %v4692_v5 }
 0x285   : > { %v4690_v46 = vpop.permute.xlu1 %2424  ;;  %v4701_v13 = vpop.permute.xlu0 %2429 }
 0x286   : > { %5605 = vst [vmem:[#allocation49_spill] sm:$0xff] %v4690_v46  ;;  %5608 = vst [vmem:[#allocation52_spill] sm:$0xff] %v4701_v13 }
 0x289   : > { %v4694_v24 = vpop.permute.xlu1 %2434  ;;  %v4713_v54 = vpop.permute.xlu0 %2439 }
 0x28a   : > { %5607 = vst [vmem:[#allocation51_spill] sm:$0xff] %v4694_v24  ;;  %5610 = vst [vmem:[#allocation54_spill] sm:$0xff] %v4713_v54 }
 0x28d   : > { %v4709_v58 = vpop.permute.xlu1 %2444  ;;  %v4724_v5 = vpop.permute.xlu0 %2449 }
 0x28e   : > { %5609 = vst [vmem:[#allocation53_spill] sm:$0xff] %v4709_v58  ;;  %5612 = vst [vmem:[#allocation56_spill] sm:$0xff] %v4724_v5 }
 0x291   : > { %v4715_v8 = vpop.permute.xlu1 %2454  ;;  %v4732_v57 = vpop.permute.xlu0 %2459 }
 0x292   : > { %5611 = vst [vmem:[#allocation55_spill] sm:$0xff] %v4715_v8  ;;  %5614 = vst [vmem:[#allocation58_spill] sm:$0xff] %v4732_v57 }
 0x2c9   : > { %v3203_v63 = vpop.f32.mrb[32].mxu1 }
 0x2ca   : > { %v4704_v20 = vadd.f32 %v3203_v63, %v4699_v43  ;;  %v1401_v50 = vpop.f32.mrb[33].mxu1 }
 0x2cb   : > { %v4707_v12 = vadd.f32 %v4699_v43, %v1401_v50 }
 0x2cc   : > { %v1568_v10 = vsub.f32 0.0, %v4704_v20 }
 0x2cd   : > { %v1567_v44 = vsub.f32 0.0, %v4707_v12 }
 0x2ce   : > { %v1601_v16 = vmul.f32 1.442695, %v1568_v10 }
 0x2cf   : > { %v1599_v24 = vmul.f32 1.442695, %v1567_v44 }
 0x2d0   : > { %3387 = vpow2.f32 %v1601_v16  ;;  %v4727_v16 = vpop.permute.xlu1 %2464 }
 0x2d1   : > { %3389 = vpow2.f32 %v1599_v24  ;;  %v3206_v13 = vpop.f32.mrb[34].mxu1  ;;  %5613 = vst [vmem:[#allocation57_spill] sm:$0xff] %v4727_v16 }
 0x2d2   : > { %v4718_v63 = vadd.f32 %v3206_v13, %v4699_v43  ;;  %v1411_v50 = vpop.f32.mrb[35].mxu1 }
 0x2d3   : > { %v4721_v40 = vadd.f32 %v4699_v43, %v1411_v50 }
 0x2d4   : > { %v1570_v58 = vsub.f32 0.0, %v4718_v63 }
 0x2d5   : > { %v1569_v10 = vsub.f32 0.0, %v4721_v40 }
 0x2d6   : > { %v1605_v54 = vmul.f32 1.442695, %v1570_v58 }
 0x2d7   : > { %v1603_v44 = vmul.f32 1.442695, %v1569_v10 }
 0x2d8   : > { %3391 = vpow2.f32 %v1605_v54 }
 0x2d9   : > { %3393 = vpow2.f32 %v1603_v44  ;;  %v3209_v24 = vpop.f32.mrb[36].mxu1  ;;  %v4739_v44 = vpop.permute.xlu1 %2474 }
 0x2da   : > { %v3388_v8 = vpop.eup %3387  ;;  %v4730_v13 = vadd.f32 %v3209_v24, %v4699_v43  ;;  %v1421_v22 = vpop.f32.mrb[37].mxu1  ;;  %5615 = vst [vmem:[#allocation59_spill] sm:$0xff] %v4739_v44 }
 0x2db   : > { %v3390_v50 = vpop.eup %3389  ;;  %v1664_v46 = vadd.f32 1.0, %v3388_v8  ;;  %v4735_v5 = vadd.f32 %v4699_v43, %v1421_v22  ;;  %3395 = vrcp.f32 %v3388_v8  ;;  %v4743_v22 = vpop.permute.xlu0 %2469 }
 0x2dc   : > { %v1663_v58 = vadd.f32 1.0, %v3390_v50  ;;  %v1572_v10 = vsub.f32 0.0, %v4730_v13  ;;  %5616 = vst [vmem:[#allocation60_spill] sm:$0xff] %v4743_v22 }
 0x2dd   : > { %3397 = vrcp.f32 %v1664_v46  ;;  %v1571_v54 = vsub.f32 0.0, %v4735_v5 }
 0x2de   : > { %3399 = vrcp.f32 %v1663_v58  ;;  %v1609_v24 = vmul.f32 1.442695, %v1572_v10 }
 0x2df   : > { %3401 = vrcp.f32 %v3390_v50  ;;  %v1607_v57 = vmul.f32 1.442695, %v1571_v54  ;;  %v4752_v50 = vpop.permute.xlu1 %2484  ;;  %v4771_v31 = vpop.permute.xlu0 %2479 }
 0x2e0   : > { %3403 = vpow2.f32 %v1609_v24  ;;  %5617 = vst [vmem:[#allocation61_spill] sm:$0xff] %v4752_v50  ;;  %5620 = vst [vmem:[#allocation62_spill] sm:$0xff] %v4771_v31 }
 0x2e1   : > { %3405 = vpow2.f32 %v1607_v57  ;;  %v3212_v8 = vpop.f32.mrb[38].mxu1 }
 0x2e2   : > { %v3392_v16 = vpop.eup %3391  ;;  %v4747_v46 = vadd.f32 %v3212_v8, %v4699_v43  ;;  %v1431_v58 = vpop.f32.mrb[39].mxu1 }
 0x2e3   : > { %v3394_v10 = vpop.eup %3393  ;;  %v1666_v44 = vadd.f32 1.0, %v3392_v16  ;;  %v4750_v26 = vadd.f32 %v4699_v43, %v1431_v58  ;;  %3407 = vrcp.f32 %v3392_v16  ;;  %v2258_v58 = vsel %vm4493_vm1, %v4240_v49, %v4440_v53 }
 0x2e4   : > { %v1665_v54 = vadd.f32 1.0, %v3394_v10  ;;  %v1574_v57 = vsub.f32 0.0, %v4747_v46 }
 0x2e5   : > { %3409 = vrcp.f32 %v1666_v44  ;;  %v1573_v8 = vsub.f32 0.0, %v4750_v26  ;;  %v3396_v22 = vpop.eup %3395 }
 0x2e6   : > { %3411 = vrcp.f32 %v1665_v54  ;;  %v1613_v16 = vmul.f32 1.442695, %v1574_v57 }
 0x2e7   : > { %v3398_v50 = vpop.eup %3397  ;;  %3413 = vrcp.f32 %v3394_v10  ;;  %v1611_v44 = vmul.f32 1.442695, %v1573_v8  ;;  %v4784_v10 = vsel %vm2290_vm8, 1.0, %v3609_v19 }
 0x2e8   : > { %v3400_v25 = vpop.eup %3399  ;;  %v1826_v49 = vsel %vm4757_vm6, %v3398_v50, %v4704_v20  ;;  %3415 = vpow2.f32 %v1613_v16  ;;  %v2487_v20 = vsel %vm2324_vm7, %v4654_v38, 0.0  ;;  %v2527_v50 = vpop.permute.xlu1 %2526 }
 0x2e9   : > { %v3402_v53 = vpop.eup %3401  ;;  %v1924_v34 = vsel %vm1562_vm4, %v1826_v49, %v3396_v22  ;;  %v1825_v35 = vsel %vm4757_vm6, %v3400_v25, %v4707_v12  ;;  %3417 = vpow2.f32 %v1611_v44  ;;  %v3215_v54 = vpop.f32.mrb[40].mxu1  ;;  %v2650_v25 = vsel %vm2290_vm8, %v2527_v50, %v2488_v39 }
 0x2ea   : > { %v3404_v57 = vpop.eup %3403  ;;  %v2682_v8 = vmul.f32 %v2259_v48, %v1924_v34  ;;  %v1923_v22 = vsel %vm1562_vm4, %v1825_v35, %v3402_v53  ;;  %v4795_v16 = vadd.f32 %v3215_v54, %v4699_v43  ;;  %v1441_v19 = vpop.f32.mrb[41].mxu1 }
 0x2eb   : > { %v3406_v31 = vpop.eup %3405  ;;  %v2681_v12 = vmul.f32 %v2258_v58, %v1923_v22  ;;  %v1668_v44 = vadd.f32 1.0, %v3404_v57  ;;  %v4800_v28 = vadd.f32 %v4699_v43, %v1441_v19  ;;  %3419 = vrcp.f32 %v3404_v57  ;;  %v2523_v34 = vpop.permute.xlu0 %2522 }
 0x2ec   : > { %v2714_v38 = vmul.f32 %v2682_v8, %v4784_v10  ;;  %v1667_v48 = vadd.f32 1.0, %v3406_v31  ;;  %v1576_v53 = vsub.f32 0.0, %v4795_v16  ;;  %v2649_v58 = vsel %vm2290_vm8, %v2523_v34, %v2487_v20 }
 0x2ed   : > { %v2713_v54 = vmul.f32 %v2681_v12, %v4784_v10  ;;  %3421 = vrcp.f32 %v1668_v44  ;;  %v1575_v55 = vsub.f32 0.0, %v4800_v28  ;;  %v3408_v39 = vpop.eup %3407  ;;  %v2261_v22 = vsel %vm4493_vm1, %v4272_v21, %v4449_v4 }
 0x2ee   : > { %v2746_v57 = vadd.f32 %v2714_v38, %v2650_v25  ;;  %3423 = vrcp.f32 %v1667_v48  ;;  %v1617_v50 = vmul.f32 1.442695, %v1576_v53  ;;  %v2490_v4 = vsel %vm2324_vm7, %v4658_v9, 0.0 }
 0x2ef   : > { %v3410_v8 = vpop.eup %3409  ;;  %v2745_v19 = vadd.f32 %v2713_v54, %v2649_v58  ;;  %3425 = vrcp.f32 %v3406_v31  ;;  %v1615_v12 = vmul.f32 1.442695, %v1575_v55  ;;  %v2535_v9 = vpop.permute.xlu0 %2534 }
 0x2f0   : > { %v3412_v44 = vpop.eup %3411  ;;  %v2781_v20 = vsel %vm2777_vm9, %v2746_v57, %v1826_v49  ;;  %v1828_v25 = vsel %vm4757_vm6, %v3410_v8, %v4718_v63  ;;  %3427 = vpow2.f32 %v1617_v50  ;;  %v2652_v8 = vsel %vm2290_vm8, %v2535_v9, %v2490_v4 }
 0x2f1   : > { %v3414_v38 = vpop.eup %3413  ;;  %2813 = vst [vmem:[%s4812_s17 + $0x8] sm:$0xff] %v2781_v20  ;;  %v2780_v21 = vsel %vm2777_vm9, %v2745_v19, %v1825_v35  ;;  %v1926_v55 = vsel %vm1562_vm4, %v1828_v25, %v3408_v39  ;;  %v1827_v23 = vsel %vm4757_vm6, %v3412_v44, %v4721_v40  ;;  %3429 = vpow2.f32 %v1615_v12  ;;  %v3218_v42 = vpop.f32.mrb[42].mxu1 }
 0x2f2   : > { %v3416_v31 = vpop.eup %3415  ;;  %2812 = vst [vmem:[%s4812_s17] sm:$0xff] %v2780_v21  ;;  %v2684_v63 = vmul.f32 %v2261_v22, %v1926_v55  ;;  %v1925_v49 = vsel %vm1562_vm4, %v1827_v23, %v3414_v38  ;;  %v4844_v35 = vadd.f32 %v3218_v42, %v4699_v43  ;;  %v1451_v48 = vpop.f32.mrb[43].mxu1  ;;  %v2489_v40 = vsel %vm2324_vm7, %v4656_v27, 0.0 }
 0x2f3   : > { %v3418_v53 = vpop.eup %3417  ;;  %v2683_v34 = vmul.f32 %v2260_v56, %v1925_v49  ;;  %v1670_v54 = vadd.f32 1.0, %v3416_v31  ;;  %v4850_v39 = vadd.f32 %v4699_v43, %v1451_v48  ;;  %3431 = vrcp.f32 %v3416_v31  ;;  %v2531_v22 = vpop.permute.xlu1 %2530 }
 0x2f4   : > { %v2716_v58 = vmul.f32 %v2684_v63, %v4784_v10  ;;  %v1669_v57 = vadd.f32 1.0, %v3418_v53  ;;  %v1578_v50 = vsub.f32 0.0, %v4844_v35  ;;  %v2651_v12 = vsel %vm2290_vm8, %v2531_v22, %v2489_v40 }
 0x2f5   : > { %v2715_v19 = vmul.f32 %v2683_v34, %v4784_v10  ;;  %3433 = vrcp.f32 %v1670_v54  ;;  %v1577_v27 = vsub.f32 0.0, %v4850_v39  ;;  %v3420_v56 = vpop.eup %3419  ;;  %v2263_v21 = vsel %vm4493_vm1, %v4285_v11, %v4458_v62 }
 0x2f6   : > { %v2748_v44 = vadd.f32 %v2716_v58, %v2652_v8  ;;  %3435 = vrcp.f32 %v1669_v57  ;;  %v1621_v20 = vmul.f32 1.442695, %v1578_v50  ;;  %v2262_v4 = vsel %vm4493_vm1, %v4260_v61, %v4466_v15 }
 0x2f7   : > { %v3422_v38 = vpop.eup %3421  ;;  %v2747_v55 = vadd.f32 %v2715_v19, %v2651_v12  ;;  %3437 = vrcp.f32 %v3418_v53  ;;  %v1619_v42 = vmul.f32 1.442695, %v1577_v27  ;;  %v2539_v27 = vpop.permute.xlu1 %2538 }
 0x2f8   : > { %v3424_v31 = vpop.eup %3423  ;;  %v2783_v63 = vsel %vm2777_vm9, %v2748_v44, %v1828_v25  ;;  %v1830_v49 = vsel %vm4757_vm6, %v3422_v38, %v4730_v13  ;;  %3439 = vpow2.f32 %v1621_v20  ;;  %v2492_v13 = vsel %vm2324_vm7, %v4662_v32, 0.0  ;;  %v2543_v32 = vpop.permute.xlu0 %2542 }
 0x2f9   : > { %v3426_v48 = vpop.eup %3425  ;;  %2815 = vst [vmem:[%s4812_s17 + $0x18] sm:$0xff] %v2783_v63  ;;  %v2782_v11 = vsel %vm2777_vm9, %v2747_v55, %v1827_v23  ;;  %v1928_v62 = vsel %vm1562_vm4, %v1830_v49, %v3420_v56  ;;  %v1829_v61 = vsel %vm4757_vm6, %v3424_v31, %v4735_v5  ;;  %3441 = vpow2.f32 %v1619_v42  ;;  %v3221_v15 = vpop.f32.mrb[44].mxu1  ;;  %v5621_v63 = vld [vmem:[#allocation17_spill] sm:$0xff] }
 0x2fa   : > { %v3428_v25 = vpop.eup %3427  ;;  %2814 = vst [vmem:[%s4812_s17 + $0x10] sm:$0xff] %v2782_v11  ;;  %v2686_v53 = vmul.f32 %v2263_v21, %v1928_v62  ;;  %v1927_v40 = vsel %vm1562_vm4, %v1829_v61, %v3426_v48  ;;  %v4888_v23 = vadd.f32 %v3221_v15, %v4699_v43  ;;  %v1461_v34 = vpop.f32.mrb[45].mxu1  ;;  %v2491_v5 = vsel %vm2324_vm7, %v4664_v41, 0.0 }
 0x2fb   : > { %v3430_v54 = vpop.eup %3429  ;;  %v2685_v9 = vmul.f32 %v2262_v4, %v1927_v40  ;;  %v1672_v58 = vadd.f32 1.0, %v3428_v25  ;;  %v4894_v57 = vadd.f32 %v4699_v43, %v1461_v34  ;;  %3443 = vrcp.f32 %v3428_v25 }
 0x2fc   : > { %v2718_v50 = vmul.f32 %v2686_v53, %v4784_v10  ;;  %v1671_v8 = vadd.f32 1.0, %v3430_v54  ;;  %v1580_v22 = vsub.f32 0.0, %v4888_v23  ;;  %v2654_v19 = vsel %vm2290_vm8, %v2543_v32, %v2492_v13 }
 0x2fd   : > { %v2717_v56 = vmul.f32 %v2685_v9, %v4784_v10  ;;  %3445 = vrcp.f32 %v1672_v58  ;;  %v1579_v41 = vsub.f32 0.0, %v4894_v57  ;;  %v3432_v12 = vpop.eup %3431  ;;  %v2653_v44 = vsel %vm2290_vm8, %v2539_v27, %v2491_v5 }
 0x2fe   : > { %v2750_v20 = vadd.f32 %v2718_v50, %v2654_v19  ;;  %3447 = vrcp.f32 %v1671_v8  ;;  %v1625_v38 = vmul.f32 1.442695, %v1580_v22  ;;  %v2265_v55 = vsel %vm4493_vm1, %v4298_v3, %v4464_v36  ;;  %v2547_v22 = vpop.permute.xlu1 %2546 }
 0x2ff   : > { %v3434_v21 = vpop.eup %3433  ;;  %v2749_v42 = vadd.f32 %v2717_v56, %v2653_v44  ;;  %3449 = vrcp.f32 %v3430_v54  ;;  %v1623_v31 = vmul.f32 1.442695, %v1579_v41  ;;  %v2264_v48 = vsel %vm4493_vm1, %v5621_v63, %v4472_v60 }
 0x300   : > { %v3436_v4 = vpop.eup %3435  ;;  %v2785_v11 = vsel %vm2777_vm9, %v2750_v20, %v1830_v49  ;;  %v1832_v62 = vsel %vm4757_vm6, %v3434_v21, %v4747_v46  ;;  %3451 = vpow2.f32 %v1625_v38  ;;  %v2494_v46 = vsel %vm2324_vm7, %v4666_v2, 0.0  ;;  %v2551_v2 = vpop.permute.xlu0 %2550  ;;  %v5622_v20 = vld [vmem:[#allocation15_spill] sm:$0xff]  ;;  %v5623_v38 = vld [vmem:[#allocation20_spill] sm:$0xff] }
 0x301   : > { %v3438_v15 = vpop.eup %3437  ;;  %2817 = vst [vmem:[%s4812_s17 + $0x28] sm:$0xff] %v2785_v11  ;;  %v2784_v3 = vsel %vm2777_vm9, %v2749_v42, %v1829_v61  ;;  %v1930_v36 = vsel %vm1562_vm4, %v1832_v62, %v3432_v12  ;;  %v1831_v60 = vsel %vm4757_vm6, %v3436_v4, %v4750_v26  ;;  %3453 = vpow2.f32 %v1623_v31  ;;  %v3224_v25 = vpop.f32.mrb[46].mxu1  ;;  %v5624_v4 = vld [vmem:[#allocation18_spill] sm:$0xff] }
 0x302   : > { %v3440_v49 = vpop.eup %3439  ;;  %2816 = vst [vmem:[%s4812_s17 + $0x20] sm:$0xff] %v2784_v3  ;;  %v2688_v13 = vmul.f32 %v2265_v55, %v1930_v36  ;;  %v1929_v53 = vsel %vm1562_vm4, %v1831_v60, %v3438_v15  ;;  %v4932_v61 = vadd.f32 %v3224_v25, %v4699_v43  ;;  %v1471_v40 = vpop.f32.mrb[47].mxu1  ;;  %v2493_v26 = vsel %vm2324_vm7, %v4668_v17, 0.0 }
 0x303   : > { %v3442_v34 = vpop.eup %3441  ;;  %v2687_v54 = vmul.f32 %v2264_v48, %v1929_v53  ;;  %v1674_v5 = vadd.f32 1.0, %v3440_v49  ;;  %v4938_v9 = vadd.f32 %v4699_v43, %v1471_v40  ;;  %3455 = vrcp.f32 %v3440_v49 }
 0x304   : > { %v2720_v58 = vmul.f32 %v2688_v13, %v4784_v10  ;;  %v1673_v32 = vadd.f32 1.0, %v3442_v34  ;;  %v1582_v50 = vsub.f32 0.0, %v4932_v61  ;;  %v2656_v8 = vsel %vm2290_vm8, %v2551_v2, %v2494_v46 }
 0x305   : > { %v2719_v19 = vmul.f32 %v2687_v54, %v4784_v10  ;;  %3457 = vrcp.f32 %v1674_v5  ;;  %v1581_v17 = vsub.f32 0.0, %v4938_v9  ;;  %v3444_v27 = vpop.eup %3443  ;;  %v2655_v56 = vsel %vm2290_vm8, %v2547_v22, %v2493_v26 }
 0x306   : > { %v2752_v41 = vadd.f32 %v2720_v58, %v2656_v8  ;;  %3459 = vrcp.f32 %v1673_v32  ;;  %v1629_v12 = vmul.f32 1.442695, %v1582_v50  ;;  %v2267_v21 = vsel %vm4493_vm1, %v5623_v38, %v5622_v20  ;;  %v2555_v32 = vpop.permute.xlu1 %2554  ;;  %v5626_v38 = vld [vmem:[#allocation19_spill] sm:$0xff] }
 0x307   : > { %v3446_v44 = vpop.eup %3445  ;;  %v2751_v55 = vadd.f32 %v2719_v19, %v2655_v56  ;;  %3461 = vrcp.f32 %v3442_v34  ;;  %v1627_v42 = vmul.f32 1.442695, %v1581_v17  ;;  %v2266_v63 = vsel %vm4493_vm1, %v5624_v4, %v4480_v0  ;;  %v5625_v56 = vld [vmem:[#allocation22_spill] sm:$0xff] }
 0x308   : > { %v3448_v31 = vpop.eup %3447  ;;  %v2787_v48 = vsel %vm2777_vm9, %v2752_v41, %v1832_v62  ;;  %v1834_v11 = vsel %vm4757_vm6, %v3446_v44, %v4795_v16  ;;  %3463 = vpow2.f32 %v1629_v12  ;;  %v2496_v16 = vsel %vm2324_vm7, %v4670_v30, 0.0  ;;  %v2559_v30 = vpop.permute.xlu0 %2558 }
 0x309   : > { %v3450_v15 = vpop.eup %3449  ;;  %2819 = vst [vmem:[%s4812_s17 + $0x38] sm:$0xff] %v2787_v48  ;;  %v2786_v3 = vsel %vm2777_vm9, %v2751_v55, %v1831_v60  ;;  %v1932_v36 = vsel %vm1562_vm4, %v1834_v11, %v3444_v27  ;;  %v1833_v0 = vsel %vm4757_vm6, %v3448_v31, %v4800_v28  ;;  %3465 = vpow2.f32 %v1627_v42  ;;  %v3227_v25 = vpop.f32.mrb[48].mxu1 }
 0x30a   : > { %v3452_v62 = vpop.eup %3451  ;;  %2818 = vst [vmem:[%s4812_s17 + $0x30] sm:$0xff] %v2786_v3  ;;  %v2690_v49 = vmul.f32 %v2267_v21, %v1932_v36  ;;  %v1931_v46 = vsel %vm1562_vm4, %v1833_v0, %v3450_v15  ;;  %v4976_v60 = vadd.f32 %v3227_v25, %v4699_v43  ;;  %v1481_v13 = vpop.f32.mrb[49].mxu1  ;;  %v2495_v28 = vsel %vm2324_vm7, %v4672_v59, 0.0 }
 0x30b   : > { %v3454_v53 = vpop.eup %3453  ;;  %v2689_v40 = vmul.f32 %v2266_v63, %v1931_v46  ;;  %v1676_v34 = vadd.f32 1.0, %v3452_v62  ;;  %v4982_v26 = vadd.f32 %v4699_v43, %v1481_v13  ;;  %3467 = vrcp.f32 %v3452_v62 }
 0x30c   : > { %v2722_v54 = vmul.f32 %v2690_v49, %v4784_v10  ;;  %v1675_v5 = vadd.f32 1.0, %v3454_v53  ;;  %v1584_v2 = vsub.f32 0.0, %v4976_v60  ;;  %v2658_v58 = vsel %vm2290_vm8, %v2559_v30, %v2496_v16 }
 0x30d   : > { %v2721_v50 = vmul.f32 %v2689_v40, %v4784_v10  ;;  %3469 = vrcp.f32 %v1676_v34  ;;  %v1583_v59 = vsub.f32 0.0, %v4982_v26  ;;  %v3456_v8 = vpop.eup %3455  ;;  %v2657_v22 = vsel %vm2290_vm8, %v2555_v32, %v2495_v28  ;;  %v2563_v28 = vpop.permute.xlu1 %2562 }
 0x30e   : > { %v2754_v19 = vadd.f32 %v2722_v54, %v2658_v58  ;;  %3471 = vrcp.f32 %v1675_v5  ;;  %v1633_v17 = vmul.f32 1.442695, %v1584_v2  ;;  %v2269_v41 = vsel %vm4493_vm1, %v5625_v56, %v4476_v51  ;;  %v5627_v58 = vld [vmem:[#allocation24_spill] sm:$0xff] }
 0x30f   : > { %v3458_v27 = vpop.eup %3457  ;;  %v2753_v12 = vadd.f32 %v2721_v50, %v2657_v22  ;;  %3473 = vrcp.f32 %v3454_v53  ;;  %v1631_v44 = vmul.f32 1.442695, %v1583_v59  ;;  %v2268_v21 = vsel %vm4493_vm1, %v5626_v38, %v4487_v45  ;;  %v5628_v22 = vld [vmem:[#allocation21_spill] sm:$0xff] }
 0x310   : > { %v3460_v20 = vpop.eup %3459  ;;  %v2789_v55 = vsel %vm2777_vm9, %v2754_v19, %v1834_v11  ;;  %v1836_v42 = vsel %vm4757_vm6, %v3458_v27, %v4844_v35  ;;  %3475 = vpow2.f32 %v1633_v17  ;;  %v2498_v35 = vsel %vm2324_vm7, %v4674_v29, 0.0  ;;  %v2567_v29 = vpop.permute.xlu0 %2566 }
 0x311   : > { %v3462_v31 = vpop.eup %3461  ;;  %2821 = vst [vmem:[%s4812_s17 + $0x48] sm:$0xff] %v2789_v55  ;;  %v2788_v51 = vsel %vm2777_vm9, %v2753_v12, %v1833_v0  ;;  %v1934_v4 = vsel %vm1562_vm4, %v1836_v42, %v3456_v8  ;;  %v1835_v45 = vsel %vm4757_vm6, %v3460_v20, %v4850_v39  ;;  %3477 = vpow2.f32 %v1631_v44  ;;  %v3230_v63 = vpop.f32.mrb[50].mxu1 }
 0x312   : > { %v3464_v48 = vpop.eup %3463  ;;  %2820 = vst [vmem:[%s4812_s17 + $0x40] sm:$0xff] %v2788_v51  ;;  %v2692_v11 = vmul.f32 %v2269_v41, %v1934_v4  ;;  %v1933_v15 = vsel %vm1562_vm4, %v1835_v45, %v3462_v31  ;;  %v5020_v3 = vadd.f32 %v3230_v63, %v4699_v43  ;;  %v1491_v36 = vpop.f32.mrb[51].mxu1  ;;  %v2497_v39 = vsel %vm2324_vm7, %v4676_v33, 0.0 }
 0x313   : > { %v3466_v0 = vpop.eup %3465  ;;  %v2691_v25 = vmul.f32 %v2268_v21, %v1933_v15  ;;  %v1678_v62 = vadd.f32 1.0, %v3464_v48  ;;  %v5026_v16 = vadd.f32 %v4699_v43, %v1491_v36  ;;  %3479 = vrcp.f32 %v3464_v48 }
 0x314   : > { %v2724_v49 = vmul.f32 %v2692_v11, %v4784_v10  ;;  %v1677_v46 = vadd.f32 1.0, %v3466_v0  ;;  %v1586_v13 = vsub.f32 0.0, %v5020_v3  ;;  %v2660_v53 = vsel %vm2290_vm8, %v2567_v29, %v2498_v35  ;;  %v2571_v11 = vpop.permute.xlu1 %2570  ;;  %v5629_v29 = vld [vmem:[#allocation26_spill] sm:$0xff] }
 0x315   : > { %v2723_v40 = vmul.f32 %v2691_v25, %v4784_v10  ;;  %3481 = vrcp.f32 %v1678_v62  ;;  %v1585_v33 = vsub.f32 0.0, %v5026_v16  ;;  %v3468_v34 = vpop.eup %3467  ;;  %v2659_v30 = vsel %vm2290_vm8, %v2563_v28, %v2497_v39  ;;  %v5630_v28 = vld [vmem:[#allocation23_spill] sm:$0xff] }
 0x316   : > { %v2756_v54 = vadd.f32 %v2724_v49, %v2660_v53  ;;  %3483 = vrcp.f32 %v1677_v46  ;;  %v1637_v5 = vmul.f32 1.442695, %v1586_v13  ;;  %v2271_v32 = vsel %vm4493_vm1, %v5627_v58, %v4484_v52  ;;  %v5631_v58 = vld [vmem:[#allocation45_spill] sm:$0xff] }
 0x317   : > { %v3470_v2 = vpop.eup %3469  ;;  %v2755_v50 = vadd.f32 %v2723_v40, %v2659_v30  ;;  %3485 = vrcp.f32 %v3466_v0  ;;  %v1635_v59 = vmul.f32 1.442695, %v1585_v33  ;;  %v2270_v19 = vsel %vm4493_vm1, %v5628_v22, %v4497_v1 }
 0x318   : > { %v3472_v8 = vpop.eup %3471  ;;  %v2791_v17 = vsel %vm2777_vm9, %v2756_v54, %v1836_v42  ;;  %v1838_v27 = vsel %vm4757_vm6, %v3470_v2, %v4888_v23  ;;  %3487 = vpow2.f32 %v1637_v5  ;;  %v2500_v23 = vsel %vm2324_vm7, %v4678_v47, 0.0  ;;  %v2575_v47 = vpop.permute.xlu0 %2574 }
 0x319   : > { %v3474_v56 = vpop.eup %3473  ;;  %2823 = vst [vmem:[%s4812_s17 + $0x58] sm:$0xff] %v2791_v17  ;;  %v2790_v52 = vsel %vm2777_vm9, %v2755_v50, %v1835_v45  ;;  %v1936_v41 = vsel %vm1562_vm4, %v1838_v27, %v3468_v34  ;;  %v1837_v1 = vsel %vm4757_vm6, %v3472_v8, %v4894_v57  ;;  %3489 = vpow2.f32 %v1635_v59  ;;  %v3233_v12 = vpop.f32.mrb[52].mxu1 }
 0x31a   : > { %v3476_v44 = vpop.eup %3475  ;;  %2822 = vst [vmem:[%s4812_s17 + $0x50] sm:$0xff] %v2790_v52  ;;  %v2694_v20 = vmul.f32 %v2271_v32, %v1936_v41  ;;  %v1935_v38 = vsel %vm1562_vm4, %v1837_v1, %v3474_v56  ;;  %v5064_v21 = vadd.f32 %v3233_v12, %v4699_v43  ;;  %v1501_v55 = vpop.f32.mrb[53].mxu1  ;;  %v2499_v57 = vsel %vm2324_vm7, %v4680_v37, 0.0 }
 0x31b   : > { %v3478_v42 = vpop.eup %3477  ;;  %v2693_v31 = vmul.f32 %v2270_v19, %v1935_v38  ;;  %v1680_v51 = vadd.f32 1.0, %v3476_v44  ;;  %v5070_v4 = vadd.f32 %v4699_v43, %v1501_v55  ;;  %3491 = vrcp.f32 %v3476_v44  ;;  %v5632_v19 = vld [vmem:[#allocation46_spill] sm:$0xff] }
 0x31c   : > { %v2726_v45 = vmul.f32 %v2694_v20, %v4784_v10  ;;  %v1679_v63 = vadd.f32 1.0, %v3478_v42  ;;  %v1588_v48 = vsub.f32 0.0, %v5064_v21  ;;  %v2662_v35 = vsel %vm2290_vm8, %v2575_v47, %v2500_v23  ;;  %v2583_v52 = vpop.permute.xlu0 %2582  ;;  %v2579_v23 = vpop.permute.xlu1 %2578 }
 0x31d   : > { %v2725_v15 = vmul.f32 %v2693_v31, %v4784_v10  ;;  %3493 = vrcp.f32 %v1680_v51  ;;  %v1587_v37 = vsub.f32 0.0, %v5070_v4  ;;  %v3480_v36 = vpop.eup %3479  ;;  %v2661_v0 = vsel %vm2290_vm8, %v2571_v11, %v2499_v57 }
 0x31e   : > { %v2758_v39 = vadd.f32 %v2726_v45, %v2662_v35  ;;  %3495 = vrcp.f32 %v1679_v63  ;;  %v1641_v25 = vmul.f32 1.442695, %v1588_v48  ;;  %v2273_v49 = vsel %vm4493_vm1, %v5629_v29, %v4491_v7  ;;  %v5635_v29 = vld [vmem:[#allocation16_spill] sm:$0xff] }
 0x31f   : > { %v3482_v62 = vpop.eup %3481  ;;  %v2757_v46 = vadd.f32 %v2725_v15, %v2661_v0  ;;  %3497 = vrcp.f32 %v3478_v42  ;;  %v1639_v13 = vmul.f32 1.442695, %v1587_v37  ;;  %v2272_v40 = vsel %vm4493_vm1, %v5630_v28, %v4507_v18 }
 0x320   : > { %v3484_v53 = vpop.eup %3483  ;;  %v2793_v33 = vsel %vm2777_vm9, %v2758_v39, %v1838_v27  ;;  %v1840_v34 = vsel %vm4757_vm6, %v3482_v62, %v4932_v61  ;;  %3499 = vpow2.f32 %v1641_v25  ;;  %v2502_v61 = vsel %vm2324_vm7, %v5631_v58, 0.0  ;;  %v5633_v25 = vld [vmem:[#allocation47_spill] sm:$0xff]  ;;  %v5634_v62 = vld [vmem:[#allocation28_spill] sm:$0xff] }
 0x321   : > { %v3486_v30 = vpop.eup %3485  ;;  %2825 = vst [vmem:[%s4812_s17 + $0x68] sm:$0xff] %v2793_v33  ;;  %v2792_v7 = vsel %vm2777_vm9, %v2757_v46, %v1837_v1  ;;  %v1938_v54 = vsel %vm1562_vm4, %v1840_v34, %v3480_v36  ;;  %v1839_v18 = vsel %vm4757_vm6, %v3484_v53, %v4938_v9  ;;  %3501 = vpow2.f32 %v1639_v13  ;;  %v3236_v5 = vpop.f32.mrb[54].mxu1 }
 0x322   : > { %v3488_v2 = vpop.eup %3487  ;;  %2824 = vst [vmem:[%s4812_s17 + $0x60] sm:$0xff] %v2792_v7  ;;  %v2696_v32 = vmul.f32 %v2273_v49, %v1938_v54  ;;  %v1937_v50 = vsel %vm1562_vm4, %v1839_v18, %v3486_v30  ;;  %v5108_v59 = vadd.f32 %v3236_v5, %v4699_v43  ;;  %v1511_v8 = vpop.f32.mrb[55].mxu1  ;;  %v2501_v9 = vsel %vm2324_vm7, %v5632_v19, 0.0  ;;  %v5639_v30 = vld [vmem:[#allocation31_spill] sm:$0xff] }
 0x323   : > { %v3490_v22 = vpop.eup %3489  ;;  %v2695_v17 = vmul.f32 %v2272_v40, %v1937_v50  ;;  %v1682_v27 = vadd.f32 1.0, %v3488_v2  ;;  %v5114_v56 = vadd.f32 %v4699_v43, %v1511_v8  ;;  %3503 = vrcp.f32 %v3488_v2  ;;  %v5637_v40 = vld [vmem:[#allocation48_spill] sm:$0xff]  ;;  %v2591_v2 = vpop.permute.xlu0 %2590 }
 0x324   : > { %v2728_v41 = vmul.f32 %v2696_v32, %v4784_v10  ;;  %v1681_v1 = vadd.f32 1.0, %v3490_v22  ;;  %v1590_v12 = vsub.f32 0.0, %v5108_v59  ;;  %v2664_v44 = vsel %vm2290_vm8, %v2583_v52, %v2502_v61  ;;  %v2587_v8 = vpop.permute.xlu1 %2586 }
 0x325   : > { %v2727_v20 = vmul.f32 %v2695_v17, %v4784_v10  ;;  %3505 = vrcp.f32 %v1682_v27  ;;  %v1589_v38 = vsub.f32 0.0, %v5114_v56  ;;  %v3492_v55 = vpop.eup %3491  ;;  %v2663_v42 = vsel %vm2290_vm8, %v2579_v23, %v2501_v9 }
 0x326   : > { %v2760_v57 = vadd.f32 %v2728_v41, %v2664_v44  ;;  %3507 = vrcp.f32 %v1681_v1  ;;  %v1645_v31 = vmul.f32 1.442695, %v1590_v12  ;;  %v5636_v49 = vsel %vm4493_vm1, %v5634_v62, %v5635_v29 }
 0x327   : > { %v3494_v51 = vpop.eup %3493  ;;  %v2759_v47 = vadd.f32 %v2727_v20, %v2663_v42  ;;  %3509 = vrcp.f32 %v3490_v22  ;;  %v1643_v45 = vmul.f32 1.442695, %v1589_v38  ;;  %v2503_v33 = vsel %vm2324_vm7, %v5637_v40, 0.0 }
 0x328   : > { %v3496_v63 = vpop.eup %3495  ;;  %v2795_v48 = vsel %vm2777_vm9, %v2760_v57, %v1840_v34  ;;  %v1842_v35 = vsel %vm4757_vm6, %v3494_v51, %v4976_v60  ;;  %3511 = vpow2.f32 %v1645_v31  ;;  %v2504_v60 = vsel %vm2324_vm7, %v5633_v25, 0.0  ;;  %v5638_v34 = vld [vmem:[#allocation25_spill] sm:$0xff] }
 0x329   : > { %v3498_v11 = vpop.eup %3497  ;;  %2827 = vst [vmem:[%s4812_s17 + $0x78] sm:$0xff] %v2795_v48  ;;  %v2794_v15 = vsel %vm2777_vm9, %v2759_v47, %v1839_v18  ;;  %v1940_v37 = vsel %vm1562_vm4, %v1842_v35, %v3492_v55  ;;  %v1841_v36 = vsel %vm4757_vm6, %v3496_v63, %v4982_v26  ;;  %3513 = vpow2.f32 %v1643_v45  ;;  %v3239_v0 = vpop.f32.mrb[56].mxu1  ;;  %v5641_v47 = vld [vmem:[#allocation49_spill] sm:$0xff]  ;;  %v5642_v45 = vld [vmem:[#allocation3_spill] sm:$0xff]  ;;  %v5643_v63 = vld [vmem:[#allocation30_spill] sm:$0xff] }
 0x32a   : > { %v3500_v39 = vpop.eup %3499  ;;  %2826 = vst [vmem:[%s4812_s17 + $0x70] sm:$0xff] %v2794_v15  ;;  %v2698_v46 = vmul.f32 %v5636_v49, %v1940_v37  ;;  %v1939_v13 = vsel %vm1562_vm4, %v1841_v36, %v3498_v11  ;;  %v5149_v53 = vadd.f32 %v3239_v0, %v4699_v43  ;;  %v1521_v26 = vpop.f32.mrb[57].mxu1  ;;  %v5640_v7 = vsel %vm4493_vm1, %v5638_v34, %v5639_v30  ;;  %v5647_v25 = vld [vmem:[#allocation33_spill] sm:$0xff] }
 0x32b   : > { %v3502_v28 = vpop.eup %3501  ;;  %v2697_v54 = vmul.f32 %v5640_v7, %v1939_v13  ;;  %v1684_v18 = vadd.f32 1.0, %v3500_v39  ;;  %v5160_v5 = vadd.f32 %v4699_v43, %v1521_v26  ;;  %3515 = vrcp.f32 %v3500_v39  ;;  %v5646_v39 = vld [vmem:[#allocation27_spill] sm:$0xff] }
 0x32c   : > { %v2730_v58 = vmul.f32 %v2698_v46, %v4784_v10  ;;  %v1683_v61 = vadd.f32 1.0, %v3502_v28  ;;  %v1592_v32 = vsub.f32 0.0, %v5149_v53  ;;  %v2666_v50 = vsel %vm2290_vm8, %v2591_v2, %v2504_v60  ;;  %v2599_v46 = vpop.permute.xlu0 %2598 }
 0x32d   : > { %v2729_v22 = vmul.f32 %v2697_v54, %v4784_v10  ;;  %3517 = vrcp.f32 %v1684_v18  ;;  %v1591_v19 = vsub.f32 0.0, %v5160_v5  ;;  %v3504_v9 = vpop.eup %3503  ;;  %v2665_v17 = vsel %vm2290_vm8, %v2587_v8, %v2503_v33  ;;  %v2595_v33 = vpop.permute.xlu1 %2594 }
 0x32e   : > { %v2762_v27 = vadd.f32 %v2730_v58, %v2666_v50  ;;  %3519 = vrcp.f32 %v1683_v61  ;;  %v1649_v52 = vmul.f32 1.442695, %v1592_v32  ;;  %v5644_v48 = vsel %vm4493_vm1, %v5642_v45, %v5643_v63 }
 0x32f   : > { %v3506_v41 = vpop.eup %3505  ;;  %v2761_v1 = vadd.f32 %v2729_v22, %v2665_v17  ;;  %3521 = vrcp.f32 %v3502_v28  ;;  %v1647_v12 = vmul.f32 1.442695, %v1591_v19  ;;  %v5648_v60 = vsel %vm4493_vm1, %v5646_v39, %v5647_v25 }
 0x330   : > { %v3508_v44 = vpop.eup %3507  ;;  %v2797_v23 = vsel %vm2777_vm9, %v2762_v27, %v1842_v35  ;;  %v1844_v20 = vsel %vm4757_vm6, %v3506_v41, %v5020_v3  ;;  %3523 = vpow2.f32 %v1649_v52  ;;  %v2506_v3 = vsel %vm2324_vm7, %v5641_v47, 0.0  ;;  %v5649_v41 = vld [vmem:[#allocation51_spill] sm:$0xff] }
 0x331   : > { %v3510_v38 = vpop.eup %3509  ;;  %2829 = vst [vmem:[%s4812_s17 + $0x88] sm:$0xff] %v2797_v23  ;;  %v2796_v55 = vsel %vm2777_vm9, %v2761_v1, %v1841_v36  ;;  %v1942_v42 = vsel %vm1562_vm4, %v1844_v20, %v3504_v9  ;;  %v1843_v57 = vsel %vm4757_vm6, %v3508_v44, %v5026_v16  ;;  %3525 = vpow2.f32 %v1647_v12  ;;  %v3242_v31 = vpop.f32.mrb[58].mxu1  ;;  %v5645_v36 = vld [vmem:[#allocation50_spill] sm:$0xff]  ;;  %v5650_v1 = vld [vmem:[#allocation5_spill] sm:$0xff]  ;;  %v5651_v12 = vld [vmem:[#allocation32_spill] sm:$0xff] }
 0x332   : > { %v3512_v51 = vpop.eup %3511  ;;  %2828 = vst [vmem:[%s4812_s17 + $0x80] sm:$0xff] %v2796_v55  ;;  %v2700_v35 = vmul.f32 %v5644_v48, %v1942_v42  ;;  %v1941_v11 = vsel %vm1562_vm4, %v1843_v57, %v3510_v38  ;;  %v5195_v15 = vadd.f32 %v3242_v31, %v4699_v43  ;;  %v1531_v16 = vpop.f32.mrb[59].mxu1  ;;  %v2505_v0 = vsel %vm2324_vm7, %v5645_v36, 0.0  ;;  %v5655_v47 = vld [vmem:[#allocation35_spill] sm:$0xff] }
 0x333   : > { %v3514_v37 = vpop.eup %3513  ;;  %v2699_v62 = vmul.f32 %v5648_v60, %v1941_v11  ;;  %v1686_v29 = vadd.f32 1.0, %v3512_v51  ;;  %v5206_v49 = vadd.f32 %v4699_v43, %v1531_v16  ;;  %3527 = vrcp.f32 %v3512_v51  ;;  %v5654_v51 = vld [vmem:[#allocation29_spill] sm:$0xff] }
 0x334   : > { %v2732_v13 = vmul.f32 %v2700_v35, %v4784_v10  ;;  %v1685_v26 = vadd.f32 1.0, %v3514_v37  ;;  %v1594_v28 = vsub.f32 0.0, %v5195_v15  ;;  %v2668_v40 = vsel %vm2290_vm8, %v2599_v46, %v2506_v3  ;;  %v2607_v35 = vpop.permute.xlu0 %2606 }
 0x335   : > { %v2731_v34 = vmul.f32 %v2699_v62, %v4784_v10  ;;  %3529 = vrcp.f32 %v1686_v29  ;;  %v1593_v30 = vsub.f32 0.0, %v5206_v49  ;;  %v3516_v7 = vpop.eup %3515  ;;  %v2667_v43 = vsel %vm2290_vm8, %v2595_v33, %v2505_v0  ;;  %v2603_v0 = vpop.permute.xlu1 %2602 }
 0x336   : > { %v2764_v54 = vadd.f32 %v2732_v13, %v2668_v40  ;;  %3531 = vrcp.f32 %v1685_v26  ;;  %v1653_v18 = vmul.f32 1.442695, %v1594_v28  ;;  %v5652_v44 = vsel %vm4493_vm1, %v5650_v1, %v5651_v12 }
 0x337   : > { %v3518_v2 = vpop.eup %3517  ;;  %v2763_v58 = vadd.f32 %v2731_v34, %v2667_v43  ;;  %3533 = vrcp.f32 %v3514_v37  ;;  %v1651_v61 = vmul.f32 1.442695, %v1593_v30  ;;  %v5656_v3 = vsel %vm4493_vm1, %v5654_v51, %v5655_v47 }
 0x338   : > { %v3520_v32 = vpop.eup %3519  ;;  %v2799_v50 = vsel %vm2777_vm9, %v2764_v54, %v1844_v20  ;;  %v1846_v8 = vsel %vm4757_vm6, %v3518_v2, %v5064_v21  ;;  %3535 = vpow2.f32 %v1653_v18  ;;  %v2508_v21 = vsel %vm2324_vm7, %v5649_v41, 0.0  ;;  %v5663_v41 = vld [vmem:[#allocation37_spill] sm:$0xff] }
 0x339   : > { %v3522_v22 = vpop.eup %3521  ;;  %2831 = vst [vmem:[%s4812_s17 + $0x98] sm:$0xff] %v2799_v50  ;;  %v2798_v19 = vsel %vm2777_vm9, %v2763_v58, %v1843_v57  ;;  %v1944_v9 = vsel %vm1562_vm4, %v1846_v8, %v3516_v7  ;;  %v1845_v17 = vsel %vm4757_vm6, %v3520_v32, %v5070_v4  ;;  %3537 = vpow2.f32 %v1651_v61  ;;  %v3245_v27 = vpop.f32.mrb[60].mxu1  ;;  %v3579_v4 = vld [vmem:[%s5481_s7] ss:$0 sm:$0xff]  ;;  %v5653_v57 = vld [vmem:[#allocation52_spill] sm:$0xff]  ;;  %v5657_v58 = vld [vmem:[#allocation53_spill] sm:$0xff] }
 0x33a   : > { %v3524_v52 = vpop.eup %3523  ;;  %2830 = vst [vmem:[%s4812_s17 + $0x90] sm:$0xff] %v2798_v19  ;;  %v2702_v23 = vmul.f32 %v5652_v44, %v1944_v9  ;;  %v1943_v20 = vsel %vm1562_vm4, %v1845_v17, %v3522_v22  ;;  %v5243_v38 = vadd.f32 %v3579_v4, %v3245_v27  ;;  %v1541_v55 = vpop.f32.mrb[61].mxu1  ;;  %v2507_v31 = vsel %vm2324_vm7, %v5653_v57, 0.0  ;;  %v5658_v61 = vld [vmem:[#allocation7_spill] sm:$0xff]  ;;  %v5659_v32 = vld [vmem:[#allocation34_spill] sm:$0xff] }
 0x33b   : > { %v3526_v42 = vpop.eup %3525  ;;  %v2701_v45 = vmul.f32 %v5656_v3, %v1943_v20  ;;  %v1688_v63 = vadd.f32 1.0, %v3524_v52  ;;  %v5253_v48 = vadd.f32 %v3579_v4, %v1541_v55  ;;  %3539 = vrcp.f32 %v3524_v52  ;;  %v5662_v52 = vld [vmem:[#allocation4_spill] sm:$0xff] }
 0x33c   : > { %v2734_v11 = vmul.f32 %v2702_v23, %v4784_v10  ;;  %v1687_v16 = vadd.f32 1.0, %v3526_v42  ;;  %v1596_v37 = vsub.f32 0.0, %v5243_v38  ;;  %v2670_v36 = vsel %vm2290_vm8, %v2607_v35, %v2508_v21  ;;  %v2615_v23 = vpop.permute.xlu0 %2614 }
 0x33d   : > { %v2733_v39 = vmul.f32 %v2701_v45, %v4784_v10  ;;  %3541 = vrcp.f32 %v1688_v63  ;;  %v1595_v25 = vsub.f32 0.0, %v5253_v48  ;;  %v3528_v60 = vpop.eup %3527  ;;  %v2669_v62 = vsel %vm2290_vm8, %v2603_v0, %v2507_v31  ;;  %v2611_v31 = vpop.permute.xlu1 %2610 }
 0x33e   : > { %v2766_v29 = vadd.f32 %v2734_v11, %v2670_v36  ;;  %3543 = vrcp.f32 %v1687_v16  ;;  %v1657_v46 = vmul.f32 1.442695, %v1596_v37  ;;  %v5660_v50 = vsel %vm4493_vm1, %v5658_v61, %v5659_v32 }
 0x33f   : > { %v3530_v13 = vpop.eup %3529  ;;  %v2765_v26 = vadd.f32 %v2733_v39, %v2669_v62  ;;  %3545 = vrcp.f32 %v3526_v42  ;;  %v1655_v28 = vmul.f32 1.442695, %v1595_v25  ;;  %v5664_v21 = vsel %vm4493_vm1, %v5662_v52, %v5663_v41 }
 0x340   : > { %v3532_v40 = vpop.eup %3531  ;;  %v2801_v33 = vsel %vm2777_vm9, %v2766_v29, %v1846_v8  ;;  %v1848_v34 = vsel %vm4757_vm6, %v3530_v13, %v5108_v59  ;;  %3547 = vpow2.f32 %v1657_v46  ;;  %v2510_v59 = vsel %vm2324_vm7, %v5657_v58, 0.0  ;;  %v5665_v46 = vld [vmem:[#allocation55_spill] sm:$0xff]  ;;  %v2623_v58 = vpop.permute.xlu0 %2622 }
 0x341   : > { %v3534_v30 = vpop.eup %3533  ;;  %2833 = vst [vmem:[%s4812_s17 + $0xa8] sm:$0xff] %v2801_v33  ;;  %v2800_v7 = vsel %vm2777_vm9, %v2765_v26, %v1845_v17  ;;  %v1946_v43 = vsel %vm1562_vm4, %v1848_v34, %v3528_v60  ;;  %v1847_v54 = vsel %vm4757_vm6, %v3532_v40, %v5114_v56  ;;  %3549 = vpow2.f32 %v1655_v28  ;;  %v3248_v18 = vpop.f32.mrb[62].mxu1  ;;  %v5661_v17 = vld [vmem:[#allocation54_spill] sm:$0xff]  ;;  %v5667_v26 = vld [vmem:[#allocation36_spill] sm:$0xff] }
 0x342   : > { %v3536_v2 = vpop.eup %3535  ;;  %2832 = vst [vmem:[%s4812_s17 + $0xa0] sm:$0xff] %v2800_v7  ;;  %v2704_v8 = vmul.f32 %v5660_v50, %v1946_v43  ;;  %v1945_v22 = vsel %vm1562_vm4, %v1847_v54, %v3534_v30  ;;  %v5287_v19 = vadd.f32 %v3579_v4, %v3248_v18  ;;  %v1551_v56 = vpop.f32.mrb[63].mxu1  ;;  %v2509_v27 = vsel %vm2324_vm7, %v5661_v17, 0.0  ;;  %v5669_v30 = vld [vmem:[#allocation56_spill] sm:$0xff]  ;;  %v5670_v7 = vld [vmem:[#allocation6_spill] sm:$0xff]  ;;  %v5671_v43 = vld [vmem:[#allocation39_spill] sm:$0xff] }
 0x343   : > { %v3538_v9 = vpop.eup %3537  ;;  %v2703_v1 = vmul.f32 %v5664_v21, %v1945_v22  ;;  %v1690_v12 = vadd.f32 1.0, %v3536_v2  ;;  %v5297_v44 = vadd.f32 %v3579_v4, %v1551_v56  ;;  %3551 = vrcp.f32 %v3536_v2  ;;  %v2619_v50 = vpop.permute.xlu1 %2618 }
 0x344   : > { %v2736_v20 = vmul.f32 %v2704_v8, %v4784_v10  ;;  %v1689_v55 = vadd.f32 1.0, %v3538_v9  ;;  %v1598_v42 = vsub.f32 0.0, %v5287_v19  ;;  %v2672_v57 = vsel %vm2290_vm8, %v2615_v23, %v2510_v59 }
 0x345   : > { %v2735_v51 = vmul.f32 %v2703_v1, %v4784_v10  ;;  %3553 = vrcp.f32 %v1690_v12  ;;  %v1597_v47 = vsub.f32 0.0, %v5297_v44  ;;  %v3540_v3 = vpop.eup %3539  ;;  %v2671_v4 = vsel %vm2290_vm8, %v2611_v31, %v2509_v27  ;;  %v5675_v31 = vld [vmem:[#allocation38_spill] sm:$0xff] }
 0x346   : > { %v2768_v45 = vadd.f32 %v2736_v20, %v2672_v57  ;;  %3555 = vrcp.f32 %v1689_v55  ;;  %v1661_v63 = vmul.f32 1.442695, %v1598_v42  ;;  %v2512_v13 = vsel %vm2324_vm7, %v5665_v46, 0.0  ;;  %v5673_v42 = vld [vmem:[#allocation57_spill] sm:$0xff] }
 0x347   : > { %v3542_v35 = vpop.eup %3541  ;;  %v2767_v11 = vadd.f32 %v2735_v51, %v2671_v4  ;;  %3557 = vrcp.f32 %v3538_v9  ;;  %v1659_v16 = vmul.f32 1.442695, %v1597_v47  ;;  %v2674_v32 = vsel %vm2290_vm8, %v2623_v58, %v2512_v13 }
 0x348   : > { %v3544_v37 = vpop.eup %3543  ;;  %v2803_v36 = vsel %vm2777_vm9, %v2768_v45, %v1848_v34  ;;  %v1850_v0 = vsel %vm4757_vm6, %v3542_v35, %v5149_v53  ;;  %3559 = vpow2.f32 %v1661_v63  ;;  %v5666_v53 = vld [vmem:[#allocation9_spill] sm:$0xff]  ;;  %v2514_v57 = vsel %vm2324_vm7, %v5673_v42, 0.0  ;;  %v5677_v45 = vld [vmem:[#allocation58_spill] sm:$0xff]  ;;  %v5678_v63 = vld [vmem:[#allocation8_spill] sm:$0xff] }
 0x349   : > { %v3546_v39 = vpop.eup %3545  ;;  %2835 = vst [vmem:[%s4812_s17 + $0xb8] sm:$0xff] %v2803_v36  ;;  %v2802_v25 = vsel %vm2777_vm9, %v2767_v11, %v1847_v54  ;;  %v1948_v60 = vsel %vm1562_vm4, %v1850_v0, %v3540_v3  ;;  %v1849_v62 = vsel %vm4757_vm6, %v3544_v37, %v5160_v5  ;;  %3561 = vpow2.f32 %v1659_v16  ;;  %v5679_v35 = vld [vmem:[#allocation41_spill] sm:$0xff]  ;;  %v2631_v36 = vpop.permute.xlu0 %2630 }
 0x34a   : > { %v3548_v29 = vpop.eup %3547  ;;  %2834 = vst [vmem:[%s4812_s17 + $0xb0] sm:$0xff] %v2802_v25  ;;  %v5668_v28 = vsel %vm4493_vm1, %v5666_v53, %v5667_v26  ;;  %v1947_v33 = vsel %vm1562_vm4, %v1849_v62, %v3546_v39  ;;  %v2511_v5 = vsel %vm2324_vm7, %v5669_v30, 0.0  ;;  %v5672_v54 = vsel %vm4493_vm1, %v5670_v7, %v5671_v43  ;;  %v5681_v43 = vld [vmem:[#allocation59_spill] sm:$0xff] }
 0x34b   : > { %v2706_v40 = vmul.f32 %v5668_v28, %v1948_v60  ;;  %v3550_v34 = vpop.eup %3549  ;;  %v2705_v18 = vmul.f32 %v5672_v54, %v1947_v33  ;;  %v1692_v2 = vadd.f32 1.0, %v3548_v29  ;;  %3563 = vrcp.f32 %v3548_v29  ;;  %v2627_v60 = vpop.permute.xlu1 %2626 }
 0x34c   : > { %v1691_v61 = vadd.f32 1.0, %v3550_v34  ;;  %v2673_v56 = vsel %vm2290_vm8, %v2619_v50, %v2511_v5  ;;  %v5680_v11 = vsel %vm4493_vm1, %v5678_v63, %v5679_v35  ;;  %v2676_v25 = vsel %vm2290_vm8, %v2631_v36, %v2514_v57  ;;  %v5687_v50 = vld [vmem:[#allocation43_spill] sm:$0xff] }
 0x34d   : > { %v2738_v59 = vmul.f32 %v2706_v40, %v4784_v10  ;;  %v2737_v8 = vmul.f32 %v2705_v18, %v4784_v10  ;;  %3565 = vrcp.f32 %v1692_v2  ;;  %v3552_v22 = vpop.eup %3551  ;;  %v2516_v54 = vsel %vm2324_vm7, %v5681_v43, 0.0  ;;  %v5683_v18 = vld [vmem:[#allocation40_spill] sm:$0xff] }
 0x34e   : > { %3567 = vrcp.f32 %v1691_v61  ;;  %v5685_v61 = vld [vmem:[#allocation60_spill] sm:$0xff] }
 0x34f   : > { %v2770_v9 = vadd.f32 %v2738_v59, %v2674_v32  ;;  %v3554_v17 = vpop.eup %3553  ;;  %v2769_v27 = vadd.f32 %v2737_v8, %v2673_v56  ;;  %3569 = vrcp.f32 %v3550_v34  ;;  %v2515_v32 = vsel %vm2324_vm7, %v5685_v61, 0.0  ;;  %v2639_v56 = vpop.permute.xlu0 %2638 }
 0x350   : > { %v3556_v52 = vpop.eup %3555  ;;  %v1852_v21 = vsel %vm4757_vm6, %v3554_v17, %v5195_v15  ;;  %v5674_v15 = vld [vmem:[#allocation11_spill] sm:$0xff]  ;;  %v2678_v17 = vsel %vm2290_vm8, %v2639_v56, %v2516_v54 }
 0x351   : > { %v2805_v41 = vsel %vm2777_vm9, %v2770_v9, %v1850_v0  ;;  %v3558_v1 = vpop.eup %3557  ;;  %v2804_v12 = vsel %vm2777_vm9, %v2769_v27, %v1849_v62  ;;  %v1950_v23 = vsel %vm1562_vm4, %v1852_v21, %v3552_v22  ;;  %v1851_v20 = vsel %vm4757_vm6, %v3556_v52, %v5206_v49  ;;  %v2635_v27 = vpop.permute.xlu1 %2634 }
 0x352   : > { %2837 = vst [vmem:[%s4812_s17 + $0xc8] sm:$0xff] %v2805_v41  ;;  %v3560_v55 = vpop.eup %3559  ;;  %2836 = vst [vmem:[%s4812_s17 + $0xc0] sm:$0xff] %v2804_v12  ;;  %v5676_v51 = vsel %vm4493_vm1, %v5674_v15, %v5675_v31  ;;  %v1949_v3 = vsel %vm1562_vm4, %v1851_v20, %v3558_v1  ;;  %v2513_v49 = vsel %vm2324_vm7, %v5677_v45, 0.0  ;;  %v5691_v45 = vld [vmem:[#allocation42_spill] sm:$0xff] }
 0x353   : > { %v2708_v47 = vmul.f32 %v5676_v51, %v1950_v23  ;;  %v3562_v4 = vpop.eup %3561  ;;  %v2707_v16 = vmul.f32 %v5680_v11, %v1949_v3  ;;  %v1694_v37 = vadd.f32 1.0, %v3560_v55  ;;  %3571 = vrcp.f32 %v3560_v55  ;;  %v5693_v11 = vld [vmem:[#allocation62_spill] sm:$0xff] }
 0x354   : > { %v1693_v39 = vadd.f32 1.0, %v3562_v4  ;;  %v2675_v46 = vsel %vm2290_vm8, %v2627_v60, %v2513_v49  ;;  %v2517_v24 = vsel %vm2324_vm7, %v5693_v11, 0.0 }
 0x355   : > { %v2740_v0 = vmul.f32 %v2708_v47, %v4784_v10  ;;  %v2739_v62 = vmul.f32 %v2707_v16, %v4784_v10  ;;  %3573 = vrcp.f32 %v1694_v37  ;;  %v3564_v29 = vpop.eup %3563  ;;  %v5689_v47 = vld [vmem:[#allocation61_spill] sm:$0xff]  ;;  %v5694_v16 = vld [vmem:[#allocation12_spill] sm:$0xff] }
 0x356   : > { %3575 = vrcp.f32 %v1693_v39  ;;  %v2518_v3 = vsel %vm2324_vm7, %v5689_v47, 0.0  ;;  %v5695_v37 = vld [vmem:[#allocation44_spill] sm:$0xff] }
 0x357   : > { %v2772_v13 = vadd.f32 %v2740_v0, %v2676_v25  ;;  %v3566_v53 = vpop.eup %3565  ;;  %v2771_v26 = vadd.f32 %v2739_v62, %v2675_v46  ;;  %3577 = vrcp.f32 %v3562_v4  ;;  %v2647_v4 = vpop.permute.xlu0 %2646  ;;  %v5696_v36 = vsel %vm4493_vm1, %v5694_v16, %v5695_v37 }
 0x358   : > { %v3568_v28 = vpop.eup %3567  ;;  %v1854_v33 = vsel %vm4757_vm6, %v3566_v53, %v5243_v38  ;;  %v5682_v38 = vld [vmem:[#allocation13_spill] sm:$0xff]  ;;  %v2680_v25 = vsel %vm2290_vm8, %v2647_v4, %v2518_v3 }
 0x359   : > { %v2807_v40 = vsel %vm2777_vm9, %v2772_v13, %v1852_v21  ;;  %v3570_v34 = vpop.eup %3569  ;;  %v2806_v30 = vsel %vm2777_vm9, %v2771_v26, %v1851_v20  ;;  %v1952_v5 = vsel %vm1562_vm4, %v1854_v33, %v3564_v29  ;;  %v1853_v7 = vsel %vm4757_vm6, %v3568_v28, %v5253_v48  ;;  %v5686_v48 = vld [vmem:[#allocation10_spill] sm:$0xff] }
 0x35a   : > { %2839 = vst [vmem:[%s4812_s17 + $0xd8] sm:$0xff] %v2807_v40  ;;  %2838 = vst [vmem:[%s4812_s17 + $0xd0] sm:$0xff] %v2806_v30  ;;  %v5684_v2 = vsel %vm4493_vm1, %v5682_v38, %v5683_v18  ;;  %v1951_v59 = vsel %vm1562_vm4, %v1853_v7, %v3570_v34  ;;  %v5688_v8 = vsel %vm4493_vm1, %v5686_v48, %v5687_v50 }
 0x35b   : > { %v2710_v58 = vmul.f32 %v5684_v2, %v1952_v5  ;;  %v2709_v22 = vmul.f32 %v5688_v8, %v1951_v59  ;;  %v2677_v21 = vsel %vm2290_vm8, %v2635_v27, %v2515_v32 }
 0x35d   : > { %v2742_v9 = vmul.f32 %v2710_v58, %v4784_v10  ;;  %v2741_v52 = vmul.f32 %v2709_v22, %v4784_v10  ;;  %v3572_v41 = vpop.eup %3571 }
 0x35f   : > { %v2774_v1 = vadd.f32 %v2742_v9, %v2678_v17  ;;  %v3574_v12 = vpop.eup %3573  ;;  %v2773_v23 = vadd.f32 %v2741_v52, %v2677_v21 }
 0x360   : > { %v3576_v20 = vpop.eup %3575  ;;  %v1856_v42 = vsel %vm4757_vm6, %v3574_v12, %v5287_v19  ;;  %v5690_v19 = vld [vmem:[#allocation14_spill] sm:$0xff] }
 0x361   : > { %v2809_v55 = vsel %vm2777_vm9, %v2774_v1, %v1854_v33  ;;  %v3578_v57 = vpop.eup %3577  ;;  %v2808_v15 = vsel %vm2777_vm9, %v2773_v23, %v1853_v7  ;;  %v1954_v31 = vsel %vm1562_vm4, %v1856_v42, %v3572_v41  ;;  %v1855_v51 = vsel %vm4757_vm6, %v3576_v20, %v5297_v44  ;;  %v2643_v44 = vpop.permute.xlu1 %2642 }
 0x362   : > { %2841 = vst [vmem:[%s4812_s17 + $0xe8] sm:$0xff] %v2809_v55  ;;  %2840 = vst [vmem:[%s4812_s17 + $0xe0] sm:$0xff] %v2808_v15  ;;  %v5692_v49 = vsel %vm4493_vm1, %v5690_v19, %v5691_v45  ;;  %v1953_v35 = vsel %vm1562_vm4, %v1855_v51, %v3578_v57  ;;  %v2679_v62 = vsel %vm2290_vm8, %v2643_v44, %v2517_v24 }
 0x363   : > { %v2712_v63 = vmul.f32 %v5692_v49, %v1954_v31  ;;  %v2711_v0 = vmul.f32 %v5696_v36, %v1953_v35 }
 0x365   : > { %v2744_v39 = vmul.f32 %v2712_v63, %v4784_v10  ;;  %v2743_v60 = vmul.f32 %v2711_v0, %v4784_v10 }
 0x367   : > { %v2776_v29 = vadd.f32 %v2744_v39, %v2680_v25  ;;  %v2775_v46 = vadd.f32 %v2743_v60, %v2679_v62 }
 0x369   : > { %v2811_v13 = vsel %vm2777_vm9, %v2776_v29, %v1856_v42  ;;  %v2810_v14 = vsel %vm2777_vm9, %v2775_v46, %v1855_v51 }
 0x36a   : > { %2843 = vst [vmem:[%s4812_s17 + $0xf8] sm:$0xff] %v2811_v13  ;;  %2842 = vst [vmem:[%s4812_s17 + $0xf0] sm:$0xff] %v2810_v14 }
 0x36b PF: > { %s18_s29 = sadd.s32 1, %s3602_s29   ;;  %s5697_s27 = smov %s3598_s28 }
 0x36c   : > { %p15_p5 = scmp.ge.s32.totalorder %s18_s29, 4   ;;  %s5698_s28 = smov %s5700_s30 }
 0x36e   :  { %17 = sbr.rel (!%p15_p5) target bundleno = 2 (0x2), region = 96 }

</bundles_post_ra>
